<compile_context>
chip_gen: v5e
topology: v5e:2x2
jax: 0.10.0
libtpu: 0.0.40
codegen_flags: <defaults>
</compile_context>

<pallas_src>
import functools
import math

import jax
import jax.numpy as jnp
from jax import lax
from jax.experimental import pallas as pl
from jax.experimental.pallas import tpu as pltpu


FACE_BLOCK = 8      # faces processed per inner-loop step (one sublane group)
PIXEL_TILE = 512    # lane-dense pixel tile (multiple of 128)
NUM_ATTR = 12       # uv(3) + transformed normals(3) + world verts(3) + normals(3)
NUM_COEF = 16       # 13 used (9 plane coeffs, 3 z, valid flag) padded to 16


# ----------------------------------------------------------------------------
# Geometry helpers (glue, O(V + F) work, plain JAX)
# ----------------------------------------------------------------------------
def face_vertices(vertices, faces):
    # vertices: (B, V, 3), faces: (B, F, 3) int -> (B, F, 3, 3)
    return jax.vmap(lambda v, f: v[f])(vertices, faces)


def vertex_normals(vertices, faces):
    # replicates util.vertex_normals (index_add of face cross products, normalize)
    B, V, _ = vertices.shape
    fv = face_vertices(vertices, faces)                       # (B, F, 3, 3)
    v0, v1, v2 = fv[:, :, 0], fv[:, :, 1], fv[:, :, 2]
    n_at_v1 = jnp.cross(v2 - v1, v0 - v1)
    n_at_v2 = jnp.cross(v0 - v2, v1 - v2)
    n_at_v0 = jnp.cross(v1 - v0, v2 - v0)

    def scatter(fb, a0, a1, a2):
        acc = jnp.zeros((V, 3), jnp.float32)
        acc = acc.at[fb[:, 1]].add(a1)
        acc = acc.at[fb[:, 2]].add(a2)
        acc = acc.at[fb[:, 0]].add(a0)
        return acc

    normals = jax.vmap(scatter)(faces, n_at_v0, n_at_v1, n_at_v2)
    norm = jnp.linalg.norm(normals, axis=-1, keepdims=True)
    return normals / jnp.maximum(norm, 1e-6)


def grid_sample_bilinear(img, grid):
    # img: (B, C, Hi, Wi), grid: (B, Ho, Wo, 2) in [-1, 1]
    # mode='bilinear', padding_mode='zeros', align_corners=False
    # TODO(synk): per-pixel dynamic gather kept in plain JAX.
    B, C, Hi, Wi = img.shape
    gx, gy = grid[..., 0], grid[..., 1]
    x = ((gx + 1.0) * Wi - 1.0) * 0.5
    y = ((gy + 1.0) * Hi - 1.0) * 0.5
    x0 = jnp.floor(x)
    y0 = jnp.floor(y)
    x1, y1 = x0 + 1.0, y0 + 1.0
    wa = (x1 - x) * (y1 - y)
    wb = (x1 - x) * (y - y0)
    wc = (x - x0) * (y1 - y)
    wd = (x - x0) * (y - y0)

    def sample(xi, yi):
        valid = ((xi >= 0) & (xi <= Wi - 1) & (yi >= 0) & (yi <= Hi - 1)).astype(img.dtype)
        xc = jnp.clip(xi, 0, Wi - 1).astype(jnp.int32)
        yc = jnp.clip(yi, 0, Hi - 1).astype(jnp.int32)

        def one(im_b, xb, yb, vb):
            return im_b[:, yb, xb] * vb[None]

        return jax.vmap(one)(img, xc, yc, valid)

    va, vb_, vc, vd = sample(x0, y0), sample(x0, y1), sample(x1, y0), sample(x1, y1)
    return (va * wa[:, None] + vb_ * wb[:, None] + vc * wc[:, None] + vd * wd[:, None])


# ----------------------------------------------------------------------------
# Pallas kernel 1: rasterize (z-buffer) + deferred bary interpolation (MXU)
#                  + fused SH shading + pos_mask
# ----------------------------------------------------------------------------
def _raster_shade_kernel(sh_ref, pix_ref, coef_ref, attr_ref, out_ref, *,
                         n_face_blocks, cf):
    b = pl.program_id(0)
    fb = FACE_BLOCK
    tp = pix_ref.shape[1]
    fpad = coef_ref.shape[1]

    # hoisted, loop-invariant pixel data (lane-dense (fb, tp))
    px = pix_ref[0:1, :]
    py = pix_ref[1:2, :]
    px_b = jnp.broadcast_to(px, (fb, tp))
    py_b = jnp.broadcast_to(py, (fb, tp))
    base_ids = lax.broadcasted_iota(jnp.int32, (fb, tp), 0)

    big = jnp.float32(1e10)
    carry0 = (jnp.full((1, tp), big, jnp.float32),       # zbest
              jnp.full((1, tp), -1.0, jnp.float32),      # winning face id (f32)
              jnp.zeros((1, tp), jnp.float32),           # winning w0
              jnp.zeros((1, tp), jnp.float32),           # winning w1
              jnp.zeros((1, tp), jnp.float32))           # winning w2

    def body(j, carry):
        zbest, fid, bw0, bw1, bw2 = carry
        start = pl.multiple_of(j * fb, fb)
        blk = coef_ref[0, pl.ds(start, fb), :]            # (fb, NUM_COEF) vector load
        a0 = blk[:, 0:1]; b0 = blk[:, 1:2]; c0 = blk[:, 2:3]
        a1 = blk[:, 3:4]; b1 = blk[:, 4:5]; c1 = blk[:, 5:6]
        a2 = blk[:, 6:7]; b2 = blk[:, 7:8]; c2 = blk[:, 8:9]
        z0 = blk[:, 9:10]; z1 = blk[:, 10:11]; z2 = blk[:, 11:12]
        valid = blk[:, 12:13]

        w0 = a0 * px_b + b0 * py_b + c0                   # (fb, tp)
        w1 = a1 * px_b + b1 * py_b + c1
        w2 = a2 * px_b + b2 * py_b + c2
        zf = w0 * z0 + w1 * z1 + w2 * z2
        inside = ((w0 >= 0.0) & (w1 >= 0.0) & (w2 >= 0.0)
                  & (zf >= 0.0) & (valid > 0.5))          # zf>=0: behind-plane cull
        zc = jnp.where(inside, zf, big)

        # reduce over the face block (sublane axis)
        zmin = jnp.min(zc, axis=0, keepdims=True)                          # (1, tp)
        ids = (base_ids + start).astype(jnp.float32)
        winner = inside & (zc == zmin)
        wid = jnp.min(jnp.where(winner, ids, jnp.float32(1e9)),
                      axis=0, keepdims=True)
        uniq = winner & (ids == wid)
        s0 = jnp.sum(jnp.where(uniq, w0, 0.0), axis=0, keepdims=True)
        s1 = jnp.sum(jnp.where(uniq, w1, 0.0), axis=0, keepdims=True)
        s2 = jnp.sum(jnp.where(uniq, w2, 0.0), axis=0, keepdims=True)

        better = zmin < zbest
        return (jnp.where(better, zmin, zbest),
                jnp.where(better, wid, fid),
                jnp.where(better, s0, bw0),
                jnp.where(better, s1, bw1),
                jnp.where(better, s2, bw2))

    _, fid, bw0, bw1, bw2 = lax.fori_loop(0, n_face_blocks, body, carry0)

    # --- deferred attribute interpolation via one-hot matmul on the MXU -----
    vis = (fid >= 0.0).astype(jnp.float32)                                  # (1, tp)
    onehot = (lax.broadcasted_iota(jnp.int32, (fpad, tp), 0).astype(jnp.float32)
              == fid).astype(jnp.float32)                                   # (fpad, tp)
    pix_vals = (
        jnp.dot(attr_ref[0, 0], onehot * bw0, preferred_element_type=jnp.float32)
        + jnp.dot(attr_ref[0, 1], onehot * bw1, preferred_element_type=jnp.float32)
        + jnp.dot(attr_ref[0, 2], onehot * bw2, preferred_element_type=jnp.float32))
    # pix_vals: (NUM_ATTR, tp); background pixels are exactly 0 (one-hot empty),
    # matching pixel_vals[mask] = 0 in the PyTorch reference.

    out_ref[0, 0:NUM_ATTR, :] = pix_vals
    out_ref[0, NUM_ATTR:NUM_ATTR + 1, :] = vis

    # --- fused SH shading on the interpolated world normals (channels 9:12) ---
    n0 = pix_vals[9:10, :]
    n1 = pix_vals[10:11, :]
    n2 = pix_vals[11:12, :]
    ones = jnp.ones_like(n0)
    basis = (ones, n0, n1, n2, n0 * n1, n0 * n2, n1 * n2,
             n0 * n0 - n1 * n1, 3.0 * n2 * n2 - 1.0)
    for c in range(3):
        s = jnp.zeros_like(n0)
        for i in range(9):
            s = s + (cf[i] * sh_ref[b, i * 3 + c]) * basis[i]
        out_ref[0, NUM_ATTR + 1 + c:NUM_ATTR + 2 + c, :] = s

    # --- fused pos_mask from transformed-normal z (attribute channel 5) -------
    out_ref[0, NUM_ATTR + 4:NUM_ATTR + 5, :] = (
        pix_vals[5:6, :] < -0.05).astype(jnp.float32)


def rasterize_and_shade(sh_packed, pix, coef, attr_t, constant_factor):
    batch, fpad, _ = coef.shape
    hw_pad = pix.shape[1]
    tile = PIXEL_TILE
    n_tiles = hw_pad // tile
    n_out = NUM_ATTR + 5          # 12 attrs + alpha + 3 shading + pos_mask
    kernel = functools.partial(
        _raster_shade_kernel,
        n_face_blocks=fpad // FACE_BLOCK,
        cf=tuple(float(v) for v in constant_factor))
    return pl.pallas_call(
        kernel,
        out_shape=jax.ShapeDtypeStruct((batch, n_out, hw_pad), jnp.float32),
        grid=(batch, n_tiles),
        in_specs=[
            pl.BlockSpec(memory_space=pltpu.MemorySpace.SMEM),            # sh coeffs
            pl.BlockSpec((2, tile), lambda b, t: (0, t)),                 # pixel NDC
            pl.BlockSpec((1, fpad, NUM_COEF), lambda b, t: (b, 0, 0)),    # face coeffs
            pl.BlockSpec((1, 3, NUM_ATTR, fpad), lambda b, t: (b, 0, 0, 0)),  # attrs
        ],
        out_specs=pl.BlockSpec((1, n_out, tile), lambda b, t: (b, 0, t)),
        compiler_params=pltpu.CompilerParams(
            dimension_semantics=("parallel", "parallel")),
    )(sh_packed, pix, coef, attr_t)


# ----------------------------------------------------------------------------
# Pallas kernel 2: images = albedo * shading * alpha (lane-dense composite)
# ----------------------------------------------------------------------------
def _composite_kernel(alb_ref, shd_ref, alpha_ref, out_ref):
    out_ref[...] = alb_ref[...] * shd_ref[...] * alpha_ref[...]


def composite(albedo_flat, shading_flat, alpha_flat):
    batch, _, hw_pad = albedo_flat.shape
    tile = PIXEL_TILE
    n_tiles = hw_pad // tile
    return pl.pallas_call(
        _composite_kernel,
        out_shape=jax.ShapeDtypeStruct((batch, 3, hw_pad), jnp.float32),
        grid=(batch, n_tiles),
        in_specs=[pl.BlockSpec((1, 3, tile), lambda b, t: (b, 0, t)),
                  pl.BlockSpec((1, 3, tile), lambda b, t: (b, 0, t)),
                  pl.BlockSpec((1, 1, tile), lambda b, t: (b, 0, t))],
        out_specs=pl.BlockSpec((1, 3, tile), lambda b, t: (b, 0, t)),
        compiler_params=pltpu.CompilerParams(
            dimension_semantics=("parallel", "parallel")),
    )(albedo_flat, shading_flat, alpha_flat)


# ----------------------------------------------------------------------------
# Per-face packing (O(F) precompute, plain JAX)
# ----------------------------------------------------------------------------
def pack_face_data(fv_screen, attributes):
    # fv_screen: (B, F, 3, 3) screen-space (x,y negated) verts
    # attributes: (B, F, 3, NUM_ATTR)
    B, F, _, _ = fv_screen.shape
    fpad = ((F + FACE_BLOCK - 1) // FACE_BLOCK) * FACE_BLOCK
    x, y, z = fv_screen[..., 0], fv_screen[..., 1], fv_screen[..., 2]
    x0, x1, x2 = x[..., 0], x[..., 1], x[..., 2]
    y0, y1, y2 = y[..., 0], y[..., 1], y[..., 2]
    area = (x1 - x0) * (y2 - y0) - (x2 - x0) * (y1 - y0)
    ok = jnp.abs(area) > 1e-8
    safe = jnp.where(ok, area, 1.0)
    valid = ok.astype(jnp.float32)
    A0 = (y1 - y2) / safe; B0 = (x2 - x1) / safe; C0 = (x1 * y2 - x2 * y1) / safe
    A1 = (y2 - y0) / safe; B1 = (x0 - x2) / safe; C1 = (x2 * y0 - x0 * y2) / safe
    A2 = (y0 - y1) / safe; B2 = (x1 - x0) / safe; C2 = (x0 * y1 - x1 * y0) / safe
    coef = jnp.stack([A0, B0, C0, A1, B1, C1, A2, B2, C2,
                      z[..., 0], z[..., 1], z[..., 2], valid], axis=-1)  # (B,F,13)
    coef = jnp.pad(coef, ((0, 0), (0, fpad - F), (0, NUM_COEF - 13)))    # (B,Fpad,16)
    # attribute table, lane-dense on the face axis: (B, 3, NUM_ATTR, Fpad)
    attr_t = jnp.transpose(attributes, (0, 2, 3, 1))
    attr_t = jnp.pad(attr_t, ((0, 0), (0, 0), (0, 0), (0, fpad - F)))
    return coef.astype(jnp.float32), attr_t.astype(jnp.float32)


def make_pixel_coords(height, width, hw_pad):
    # PyTorch3D NDC pixel centers (+X left, +Y up, row 0 = top), flattened row-major.
    pidx = jnp.arange(height * width, dtype=jnp.int32)
    ix = (pidx % width).astype(jnp.float32)
    iy = (pidx // width).astype(jnp.float32)
    px = 1.0 - (2.0 * ix + 1.0) / float(width)
    py = 1.0 - (2.0 * iy + 1.0) / float(height)
    pix = jnp.stack([px, py], axis=0)
    return jnp.pad(pix, ((0, 0), (0, hw_pad - height * width)),
                   constant_values=-10.0).astype(jnp.float32)


# ----------------------------------------------------------------------------
# Synthetic mesh (replaces load_obj — deterministic, in-script)
# ----------------------------------------------------------------------------
def make_grid_mesh(grid_n):
    lin = jnp.linspace(-0.8, 0.8, grid_n)
    xx, yy = jnp.meshgrid(lin, lin, indexing="xy")
    zz = 0.15 * jnp.sin(3.0 * xx) * jnp.cos(3.0 * yy)
    verts = jnp.stack([xx, yy, zz], -1).reshape(-1, 3).astype(jnp.float32)
    uvs = jnp.stack([(xx + 0.8) / 1.6, (yy + 0.8) / 1.6], -1).reshape(-1, 2).astype(jnp.float32)
    faces = []
    for i in range(grid_n - 1):
        for j in range(grid_n - 1):
            v00 = i * grid_n + j
            v01 = v00 + 1
            v10 = (i + 1) * grid_n + j
            v11 = v10 + 1
            faces.append([v00, v10, v01])
            faces.append([v01, v10, v11])
    faces = jnp.array(faces, dtype=jnp.int32)
    return verts, uvs, faces


# ----------------------------------------------------------------------------
# SRenderY (forward pass)
# ----------------------------------------------------------------------------
class SRenderYPallas:
    def __init__(self, image_size, uv_size, template_verts, verts_uvs, faces, uvfaces):
        self.image_size = int(image_size)
        self.uv_size = int(uv_size)
        self.faces = faces[None]                                   # (1, F, 3) int32
        self.uvfaces = uvfaces[None]                               # (1, F, 3) int32
        self.raw_uvcoords = verts_uvs[None]                        # (1, Vuv, 2)
        uvcoords = jnp.concatenate(
            [self.raw_uvcoords, jnp.ones_like(self.raw_uvcoords[..., :1])], -1)
        uvcoords = uvcoords * 2.0 - 1.0
        uvcoords = uvcoords.at[..., 1].multiply(-1.0)
        self.uvcoords = uvcoords                                   # (1, Vuv, 3)
        self.face_uvcoords = face_vertices(self.uvcoords, self.uvfaces)  # (1, F, 3, 3)

        hw = self.image_size * self.image_size
        self.hw_pad = ((hw + PIXEL_TILE - 1) // PIXEL_TILE) * PIXEL_TILE
        self.pixel_coords = make_pixel_coords(self.image_size, self.image_size,
                                              self.hw_pad)

        pi = math.pi
        self.constant_factor = (
            1.0 / math.sqrt(4 * pi),
            (2 * pi / 3) * math.sqrt(3 / (4 * pi)),
            (2 * pi / 3) * math.sqrt(3 / (4 * pi)),
            (2 * pi / 3) * math.sqrt(3 / (4 * pi)),
            (pi / 4) * 3 * math.sqrt(5 / (12 * pi)),
            (pi / 4) * 3 * math.sqrt(5 / (12 * pi)),
            (pi / 4) * 3 * math.sqrt(5 / (12 * pi)),
            (pi / 4) * (3 / 2) * math.sqrt(5 / (12 * pi)),
            (pi / 4) * (1 / 2) * math.sqrt(5 / (4 * pi)),
        )

    # plain-JAX equivalents of the non-SH light paths (not the demo hot path)
    @staticmethod
    def add_pointlight(vertices, normals, lights):
        lp, li = lights[:, :, :3], lights[:, :, 3:]
        d = lp[:, :, None, :] - vertices[:, None, :, :]
        d = d / jnp.maximum(jnp.linalg.norm(d, axis=3, keepdims=True), 1e-12)
        ndl = (normals[:, None, :, :] * d).sum(3)
        return (ndl[..., None] * li[:, :, None, :]).mean(1)

    @staticmethod
    def add_directionlight(normals, lights):
        ld, li = lights[:, :, :3], lights[:, :, 3:]
        d = jnp.broadcast_to(ld[:, :, None, :], ld.shape[:2] + (normals.shape[1], 3))
        d = d / jnp.maximum(jnp.linalg.norm(d, axis=3, keepdims=True), 1e-12)
        ndl = jnp.clip((normals[:, None, :, :] * d).sum(3), 0.0, 1.0)
        return (ndl[..., None] * li[:, :, None, :]).mean(1)

    def __call__(self, vertices, transformed_vertices, albedos, lights=None,
                 light_type="point"):
        B = vertices.shape[0]
        F = self.faces.shape[1]
        H = W = self.image_size
        HW = H * W
        hw_pad = self.hw_pad

        tv = transformed_vertices.at[:, :, 2].add(10.0)
        faces_b = jnp.broadcast_to(self.faces, (B, F, 3))

        fv = face_vertices(vertices, faces_b)
        normals = vertex_normals(vertices, faces_b)
        fn = face_vertices(normals, faces_b)
        tnorm = vertex_normals(tv, faces_b)
        tfn = face_vertices(tnorm, faces_b)
        face_uv_b = jnp.broadcast_to(self.face_uvcoords, (B, F, 3, 3))
        attributes = jnp.concatenate([face_uv_b, tfn, fv, fn], -1)   # (B, F, 3, 12)

        # Pytorch3dRasterizer: negate x,y then rasterize + bary-interp (kernel 1)
        fixed = tv * jnp.array([-1.0, -1.0, 1.0], jnp.float32)
        fv_screen = face_vertices(fixed, faces_b)
        coef, attr_t = pack_face_data(fv_screen, attributes)

        use_sh = (lights is not None) and (lights.shape[1] == 9)
        sh_packed = (lights.reshape(B, 27).astype(jnp.float32) if use_sh
                     else jnp.zeros((B, 27), jnp.float32))

        rast = rasterize_and_shade(sh_packed, self.pixel_coords, coef, attr_t,
                                   self.constant_factor)           # (B, 17, hw_pad)

        rend = rast[:, :NUM_ATTR + 1, :HW].reshape(B, NUM_ATTR + 1, H, W)
        alpha_images = rend[:, 12:13]
        uvcoords_images = rend[:, :3]
        grid = jnp.transpose(uvcoords_images, (0, 2, 3, 1))[..., :2]
        albedo_images = grid_sample_bilinear(albedos, grid)
        normal_images = rend[:, 9:12]
        pos_mask = rast[:, 16:17, :HW].reshape(B, 1, H, W)

        if use_sh:
            shading_images = rast[:, 13:16, :HW].reshape(B, 3, H, W)
            alb_flat = jnp.pad(albedo_images.reshape(B, 3, HW),
                               ((0, 0), (0, 0), (0, hw_pad - HW)))
            images = composite(alb_flat, rast[:, 13:16, :],
                               rast[:, 12:13, :])[:, :, :HW].reshape(B, 3, H, W)
        else:
            # non-SH light paths kept in plain JAX (not exercised in the demo)
            if lights is None:
                images_noalpha = albedo_images
                shading_images = images_noalpha * 0.0
            else:
                nrm_flat = jnp.transpose(normal_images, (0, 2, 3, 1)).reshape(B, -1, 3)
                if light_type == "point":
                    vtx_flat = jnp.transpose(rend[:, 6:9], (0, 2, 3, 1)).reshape(B, -1, 3)
                    sh = self.add_pointlight(vtx_flat, nrm_flat, lights)
                else:
                    sh = self.add_directionlight(nrm_flat, lights)
                shading_images = jnp.transpose(
                    sh.reshape(B, H, W, 3), (0, 3, 1, 2))
                images_noalpha = albedo_images * shading_images
            images = images_noalpha * alpha_images

        return {
            "images": images,
            "albedo_images": albedo_images,
            "alpha_images": alpha_images,
            "pos_mask": pos_mask,
            "shading_images": shading_images,
            "grid": grid,
            "normals": normals,
            "normal_images": normal_images,
            "transformed_normals": tnorm,
        }


# ----------------------------------------------------------------------------
# Demo
# ----------------------------------------------------------------------------
if __name__ == "__main__":
    key = jax.random.PRNGKey(0)
    k1, k2, k3, k4 = jax.random.split(key, 4)

    IMAGE_SIZE = 32
    UV_SIZE = 16
    GRID_N = 5
    BATCH = 2

    base_verts, verts_uvs, faces = make_grid_mesh(GRID_N)
    V = base_verts.shape[0]

    renderer = SRenderYPallas(IMAGE_SIZE, UV_SIZE, base_verts, verts_uvs, faces, faces)

    vertices = base_verts[None] + 0.01 * jax.random.normal(k1, (BATCH, V, 3), jnp.float32)
    transformed_vertices = (
        base_verts[None] + 0.01 * jax.random.normal(k2, (BATCH, V, 3), jnp.float32))
    albedos = jax.random.uniform(k3, (BATCH, 3, UV_SIZE, UV_SIZE), jnp.float32)
    lights = 0.3 * jax.random.normal(k4, (BATCH, 9, 3), jnp.float32)
    lights = lights.at[:, 0, :].add(1.0)   # positive DC SH term

    out = renderer(vertices, transformed_vertices, albedos, lights)
    jax.block_until_ready(out["images"])
    jax.block_until_ready(out["shading_images"])

    assert out["images"].shape == (BATCH, 3, IMAGE_SIZE, IMAGE_SIZE)
    assert out["alpha_images"].shape == (BATCH, 1, IMAGE_SIZE, IMAGE_SIZE)
    assert out["shading_images"].shape == (BATCH, 3, IMAGE_SIZE, IMAGE_SIZE)
    assert out["grid"].shape == (BATCH, IMAGE_SIZE, IMAGE_SIZE, 2)
    print("KERNEL_OK")
</pallas_src>

<mosaic_0001>
module attributes {stable_mosaic.version = 11 : i64} {
  func.func @_raster_shade_kernel(%arg0: i32, %arg1: i32, %arg2: memref<2x27xf32, #tpu.memory_space<smem>>, %arg3: memref<2x512xf32, #tpu.memory_space<vmem>>, %arg4: memref<1x32x16xf32, #tpu.memory_space<vmem>>, %arg5: memref<1x3x12x32xf32, #tpu.memory_space<vmem>>, %arg6: memref<1x17x512xf32, #tpu.memory_space<vmem>>) attributes {dimension_semantics = [#tpu.dimension_semantics<parallel>, #tpu.dimension_semantics<parallel>], iteration_bounds = array<i64: 2, 2>, scalar_prefetch = 0 : i64, scratch_operands = 0 : i64, tpu.core_type = #tpu.core_type<tc>, window_params = [{transform_indices = @transform_0, window_bounds = array<i64: 2, 27>}, {transform_indices = @transform_1, window_bounds = array<i64: 2, 512>}, {transform_indices = @transform_2, window_bounds = array<i64: 1, 32, 16>}, {transform_indices = @transform_3, window_bounds = array<i64: 1, 3, 12, 32>}, {transform_indices = @transform_4, window_bounds = array<i64: 1, 17, 512>}]} {
    %c0 = arith.constant 0 : index
    %c0_0 = arith.constant 0 : index
    %0 = vector.load %arg3[%c0, %c0_0] : memref<2x512xf32, #tpu.memory_space<vmem>>, vector<1x512xf32>
    %c1 = arith.constant 1 : index
    %c0_1 = arith.constant 0 : index
    %1 = vector.load %arg3[%c1, %c0_1] : memref<2x512xf32, #tpu.memory_space<vmem>>, vector<1x512xf32>
    %2 = vector.shape_cast %0 : vector<1x512xf32> to vector<1x512xf32>
    %3 = vector.broadcast %2 : vector<1x512xf32> to vector<8x512xf32>
    %4 = vector.shape_cast %1 : vector<1x512xf32> to vector<1x512xf32>
    %5 = vector.broadcast %4 : vector<1x512xf32> to vector<8x512xf32>
    %6 = tpu.iota {dimensions = array<i32: 0>} : vector<8x512xi32>
    %cst = arith.constant 1.000000e+10 : f32
    %7 = vector.broadcast %cst : f32 to vector<1x512xf32>
    %cst_2 = arith.constant -1.000000e+00 : f32
    %8 = vector.broadcast %cst_2 : f32 to vector<1x512xf32>
    %cst_3 = arith.constant 0.000000e+00 : f32
    %9 = vector.broadcast %cst_3 : f32 to vector<1x512xf32>
    %cst_4 = arith.constant 0.000000e+00 : f32
    %10 = vector.broadcast %cst_4 : f32 to vector<1x512xf32>
    %cst_5 = arith.constant 0.000000e+00 : f32
    %11 = vector.broadcast %cst_5 : f32 to vector<1x512xf32>
    %cst_6 = arith.constant 1.000000e+10 : f32
    %c0_i32 = arith.constant 0 : i32
    %c4_i32 = arith.constant 4 : i32
    %12 = arith.addi %c0_i32, %c4_i32 : i32
    %c1_i32 = arith.constant 1 : i32
    %13:5 = scf.for %arg7 = %c0_i32 to %12 step %c1_i32 iter_args(%arg8 = %7, %arg9 = %8, %arg10 = %9, %arg11 = %10, %arg12 = %11) -> (vector<1x512xf32>, vector<1x512xf32>, vector<1x512xf32>, vector<1x512xf32>, vector<1x512xf32>)  : i32 {
      %c8_i32 = arith.constant 8 : i32
      %244 = arith.muli %arg7, %c8_i32 : i32
      %245 = tpu.assume_multiple %244, 8 : i32
      %c0_78 = arith.constant 0 : index
      %246 = arith.index_cast %245 : i32 to index
      %c0_79 = arith.constant 0 : index
      %247 = vector.load %arg4[%c0_78, %246, %c0_79] : memref<1x32x16xf32, #tpu.memory_space<vmem>>, vector<1x8x16xf32>
      %248 = vector.shape_cast %247 : vector<1x8x16xf32> to vector<8x16xf32>
      %249 = vector.extract_strided_slice %248 {offsets = [0, 0], sizes = [8, 1], strides = [1, 1]} : vector<8x16xf32> to vector<8x1xf32>
      %250 = vector.extract_strided_slice %248 {offsets = [0, 1], sizes = [8, 1], strides = [1, 1]} : vector<8x16xf32> to vector<8x1xf32>
      %251 = vector.extract_strided_slice %248 {offsets = [0, 2], sizes = [8, 1], strides = [1, 1]} : vector<8x16xf32> to vector<8x1xf32>
      %252 = vector.extract_strided_slice %248 {offsets = [0, 3], sizes = [8, 1], strides = [1, 1]} : vector<8x16xf32> to vector<8x1xf32>
      %253 = vector.extract_strided_slice %248 {offsets = [0, 4], sizes = [8, 1], strides = [1, 1]} : vector<8x16xf32> to vector<8x1xf32>
      %254 = vector.extract_strided_slice %248 {offsets = [0, 5], sizes = [8, 1], strides = [1, 1]} : vector<8x16xf32> to vector<8x1xf32>
      %255 = vector.extract_strided_slice %248 {offsets = [0, 6], sizes = [8, 1], strides = [1, 1]} : vector<8x16xf32> to vector<8x1xf32>
      %256 = vector.extract_strided_slice %248 {offsets = [0, 7], sizes = [8, 1], strides = [1, 1]} : vector<8x16xf32> to vector<8x1xf32>
      %257 = vector.extract_strided_slice %248 {offsets = [0, 8], sizes = [8, 1], strides = [1, 1]} : vector<8x16xf32> to vector<8x1xf32>
      %258 = vector.extract_strided_slice %248 {offsets = [0, 9], sizes = [8, 1], strides = [1, 1]} : vector<8x16xf32> to vector<8x1xf32>
      %259 = vector.extract_strided_slice %248 {offsets = [0, 10], sizes = [8, 1], strides = [1, 1]} : vector<8x16xf32> to vector<8x1xf32>
      %260 = vector.extract_strided_slice %248 {offsets = [0, 11], sizes = [8, 1], strides = [1, 1]} : vector<8x16xf32> to vector<8x1xf32>
      %261 = vector.extract_strided_slice %248 {offsets = [0, 12], sizes = [8, 1], strides = [1, 1]} : vector<8x16xf32> to vector<8x1xf32>
      %262 = vector.broadcast %249 : vector<8x1xf32> to vector<8x512xf32>
      %263 = arith.mulf %262, %3 : vector<8x512xf32>
      %264 = vector.broadcast %250 : vector<8x1xf32> to vector<8x512xf32>
      %265 = arith.mulf %264, %5 : vector<8x512xf32>
      %266 = arith.addf %263, %265 : vector<8x512xf32>
      %267 = vector.broadcast %251 : vector<8x1xf32> to vector<8x512xf32>
      %268 = arith.addf %266, %267 : vector<8x512xf32>
      %269 = vector.broadcast %252 : vector<8x1xf32> to vector<8x512xf32>
      %270 = arith.mulf %269, %3 : vector<8x512xf32>
      %271 = vector.broadcast %253 : vector<8x1xf32> to vector<8x512xf32>
      %272 = arith.mulf %271, %5 : vector<8x512xf32>
      %273 = arith.addf %270, %272 : vector<8x512xf32>
      %274 = vector.broadcast %254 : vector<8x1xf32> to vector<8x512xf32>
      %275 = arith.addf %273, %274 : vector<8x512xf32>
      %276 = vector.broadcast %255 : vector<8x1xf32> to vector<8x512xf32>
      %277 = arith.mulf %276, %3 : vector<8x512xf32>
      %278 = vector.broadcast %256 : vector<8x1xf32> to vector<8x512xf32>
      %279 = arith.mulf %278, %5 : vector<8x512xf32>
      %280 = arith.addf %277, %279 : vector<8x512xf32>
      %281 = vector.broadcast %257 : vector<8x1xf32> to vector<8x512xf32>
      %282 = arith.addf %280, %281 : vector<8x512xf32>
      %283 = vector.broadcast %258 : vector<8x1xf32> to vector<8x512xf32>
      %284 = arith.mulf %268, %283 : vector<8x512xf32>
      %285 = vector.broadcast %259 : vector<8x1xf32> to vector<8x512xf32>
      %286 = arith.mulf %275, %285 : vector<8x512xf32>
      %287 = arith.addf %284, %286 : vector<8x512xf32>
      %288 = vector.broadcast %260 : vector<8x1xf32> to vector<8x512xf32>
      %289 = arith.mulf %282, %288 : vector<8x512xf32>
      %290 = arith.addf %287, %289 : vector<8x512xf32>
      %cst_80 = arith.constant 0.000000e+00 : f32
      %291 = vector.broadcast %cst_80 : f32 to vector<8x512xf32>
      %292 = arith.cmpf oge, %268, %291 : vector<8x512xf32>
      %cst_81 = arith.constant 0.000000e+00 : f32
      %293 = vector.broadcast %cst_81 : f32 to vector<8x512xf32>
      %294 = arith.cmpf oge, %275, %293 : vector<8x512xf32>
      %295 = arith.andi %292, %294 : vector<8x512xi1>
      %cst_82 = arith.constant 0.000000e+00 : f32
      %296 = vector.broadcast %cst_82 : f32 to vector<8x512xf32>
      %297 = arith.cmpf oge, %282, %296 : vector<8x512xf32>
      %298 = arith.andi %295, %297 : vector<8x512xi1>
      %cst_83 = arith.constant 0.000000e+00 : f32
      %299 = vector.broadcast %cst_83 : f32 to vector<8x512xf32>
      %300 = arith.cmpf oge, %290, %299 : vector<8x512xf32>
      %301 = arith.andi %298, %300 : vector<8x512xi1>
      %cst_84 = arith.constant 5.000000e-01 : f32
      %302 = vector.broadcast %cst_84 : f32 to vector<8x1xf32>
      %303 = arith.cmpf ogt, %261, %302 : vector<8x1xf32>
      %304 = vector.broadcast %303 : vector<8x1xi1> to vector<8x512xi1>
      %305 = arith.andi %301, %304 : vector<8x512xi1>
      %306 = vector.broadcast %cst_6 : f32 to vector<8x512xf32>
      %307 = arith.select %305, %290, %306 : vector<8x512xi1>, vector<8x512xf32>
      %cst_85 = arith.constant dense<0x7F800000> : vector<512xf32>
      %308 = vector.multi_reduction <minimumf>, %307, %cst_85 [0] : vector<8x512xf32> to vector<512xf32>
      %309 = vector.shape_cast %308 : vector<512xf32> to vector<1x512xf32>
      %310 = vector.broadcast %245 : i32 to vector<8x512xi32>
      %311 = arith.addi %6, %310 : vector<8x512xi32>
      %312 = arith.sitofp %311 : vector<8x512xi32> to vector<8x512xf32>
      %313 = vector.broadcast %309 : vector<1x512xf32> to vector<8x512xf32>
      %314 = arith.cmpf oeq, %307, %313 : vector<8x512xf32>
      %315 = arith.andi %305, %314 : vector<8x512xi1>
      %cst_86 = arith.constant 1.000000e+09 : f32
      %316 = vector.broadcast %cst_86 : f32 to vector<8x512xf32>
      %317 = arith.select %315, %312, %316 : vector<8x512xi1>, vector<8x512xf32>
      %cst_87 = arith.constant dense<0x7F800000> : vector<512xf32>
      %318 = vector.multi_reduction <minimumf>, %317, %cst_87 [0] : vector<8x512xf32> to vector<512xf32>
      %319 = vector.shape_cast %318 : vector<512xf32> to vector<1x512xf32>
      %320 = vector.broadcast %319 : vector<1x512xf32> to vector<8x512xf32>
      %321 = arith.cmpf oeq, %312, %320 : vector<8x512xf32>
      %322 = arith.andi %315, %321 : vector<8x512xi1>
      %cst_88 = arith.constant 0.000000e+00 : f32
      %323 = vector.broadcast %cst_88 : f32 to vector<8x512xf32>
      %324 = arith.select %322, %268, %323 : vector<8x512xi1>, vector<8x512xf32>
      %cst_89 = arith.constant dense<0.000000e+00> : vector<512xf32>
      %325 = vector.multi_reduction <add>, %324, %cst_89 [0] : vector<8x512xf32> to vector<512xf32>
      %326 = vector.shape_cast %325 : vector<512xf32> to vector<1x512xf32>
      %cst_90 = arith.constant 0.000000e+00 : f32
      %327 = vector.broadcast %cst_90 : f32 to vector<8x512xf32>
      %328 = arith.select %322, %275, %327 : vector<8x512xi1>, vector<8x512xf32>
      %cst_91 = arith.constant dense<0.000000e+00> : vector<512xf32>
      %329 = vector.multi_reduction <add>, %328, %cst_91 [0] : vector<8x512xf32> to vector<512xf32>
      %330 = vector.shape_cast %329 : vector<512xf32> to vector<1x512xf32>
      %cst_92 = arith.constant 0.000000e+00 : f32
      %331 = vector.broadcast %cst_92 : f32 to vector<8x512xf32>
      %332 = arith.select %322, %282, %331 : vector<8x512xi1>, vector<8x512xf32>
      %cst_93 = arith.constant dense<0.000000e+00> : vector<512xf32>
      %333 = vector.multi_reduction <add>, %332, %cst_93 [0] : vector<8x512xf32> to vector<512xf32>
      %334 = vector.shape_cast %333 : vector<512xf32> to vector<1x512xf32>
      %335 = arith.cmpf olt, %309, %arg8 : vector<1x512xf32>
      %336 = arith.select %335, %309, %arg8 : vector<1x512xi1>, vector<1x512xf32>
      %337 = arith.select %335, %319, %arg9 : vector<1x512xi1>, vector<1x512xf32>
      %338 = arith.select %335, %326, %arg10 : vector<1x512xi1>, vector<1x512xf32>
      %339 = arith.select %335, %330, %arg11 : vector<1x512xi1>, vector<1x512xf32>
      %340 = arith.select %335, %334, %arg12 : vector<1x512xi1>, vector<1x512xf32>
      scf.yield %336, %337, %338, %339, %340 : vector<1x512xf32>, vector<1x512xf32>, vector<1x512xf32>, vector<1x512xf32>, vector<1x512xf32>
    }
    %c4_i32_7 = arith.constant 4 : i32
    %cst_8 = arith.constant 0.000000e+00 : f32
    %14 = vector.broadcast %cst_8 : f32 to vector<1x512xf32>
    %15 = arith.cmpf oge, %13#1, %14 : vector<1x512xf32>
    %16 = arith.extui %15 : vector<1x512xi1> to vector<1x512xi32>
    %17 = arith.sitofp %16 : vector<1x512xi32> to vector<1x512xf32>
    %18 = tpu.iota {dimensions = array<i32: 0>} : vector<32x512xi32>
    %19 = arith.sitofp %18 : vector<32x512xi32> to vector<32x512xf32>
    %20 = vector.broadcast %13#1 : vector<1x512xf32> to vector<32x512xf32>
    %21 = arith.cmpf oeq, %19, %20 : vector<32x512xf32>
    %22 = arith.extui %21 : vector<32x512xi1> to vector<32x512xi32>
    %23 = arith.sitofp %22 : vector<32x512xi32> to vector<32x512xf32>
    %c0_9 = arith.constant 0 : index
    %c0_10 = arith.constant 0 : index
    %c0_11 = arith.constant 0 : index
    %c0_12 = arith.constant 0 : index
    %24 = vector.load %arg5[%c0_9, %c0_10, %c0_11, %c0_12] : memref<1x3x12x32xf32, #tpu.memory_space<vmem>>, vector<1x1x12x32xf32>
    %25 = vector.shape_cast %24 : vector<1x1x12x32xf32> to vector<12x32xf32>
    %26 = vector.broadcast %13#2 : vector<1x512xf32> to vector<32x512xf32>
    %27 = arith.mulf %23, %26 : vector<32x512xf32>
    %cst_13 = arith.constant dense<0.000000e+00> : vector<12x512xf32>
    %28 = tpu.matmul %25, %27, %cst_13 {dimension_numbers = #tpu.dot_dimension_numbers<[1], [0], [0], [1], [0, 0, 1, 1], [], []>} : vector<12x32xf32>, vector<32x512xf32>, vector<12x512xf32> -> vector<12x512xf32>
    %c0_14 = arith.constant 0 : index
    %c1_15 = arith.constant 1 : index
    %c0_16 = arith.constant 0 : index
    %c0_17 = arith.constant 0 : index
    %29 = vector.load %arg5[%c0_14, %c1_15, %c0_16, %c0_17] : memref<1x3x12x32xf32, #tpu.memory_space<vmem>>, vector<1x1x12x32xf32>
    %30 = vector.shape_cast %29 : vector<1x1x12x32xf32> to vector<12x32xf32>
    %31 = vector.broadcast %13#3 : vector<1x512xf32> to vector<32x512xf32>
    %32 = arith.mulf %23, %31 : vector<32x512xf32>
    %cst_18 = arith.constant dense<0.000000e+00> : vector<12x512xf32>
    %33 = tpu.matmul %30, %32, %cst_18 {dimension_numbers = #tpu.dot_dimension_numbers<[1], [0], [0], [1], [0, 0, 1, 1], [], []>} : vector<12x32xf32>, vector<32x512xf32>, vector<12x512xf32> -> vector<12x512xf32>
    %34 = arith.addf %28, %33 : vector<12x512xf32>
    %c0_19 = arith.constant 0 : index
    %c2 = arith.constant 2 : index
    %c0_20 = arith.constant 0 : index
    %c0_21 = arith.constant 0 : index
    %35 = vector.load %arg5[%c0_19, %c2, %c0_20, %c0_21] : memref<1x3x12x32xf32, #tpu.memory_space<vmem>>, vector<1x1x12x32xf32>
    %36 = vector.shape_cast %35 : vector<1x1x12x32xf32> to vector<12x32xf32>
    %37 = vector.broadcast %13#4 : vector<1x512xf32> to vector<32x512xf32>
    %38 = arith.mulf %23, %37 : vector<32x512xf32>
    %cst_22 = arith.constant dense<0.000000e+00> : vector<12x512xf32>
    %39 = tpu.matmul %36, %38, %cst_22 {dimension_numbers = #tpu.dot_dimension_numbers<[1], [0], [0], [1], [0, 0, 1, 1], [], []>} : vector<12x32xf32>, vector<32x512xf32>, vector<12x512xf32> -> vector<12x512xf32>
    %40 = arith.addf %34, %39 : vector<12x512xf32>
    %c0_23 = arith.constant 0 : index
    %c0_24 = arith.constant 0 : index
    %c0_25 = arith.constant 0 : index
    %41 = vector.load %arg6[%c0_23, %c0_24, %c0_25] : memref<1x17x512xf32, #tpu.memory_space<vmem>>, vector<1x12x512xf32>
    %42 = vector.shape_cast %41 : vector<1x12x512xf32> to vector<12x512xf32>
    %43 = vector.shape_cast %40 : vector<12x512xf32> to vector<1x12x512xf32>
    tpu.vector_store %arg6[%c0_23, %c0_24, %c0_25], %43 {strides = array<i32>} : memref<1x17x512xf32, #tpu.memory_space<vmem>>, vector<1x12x512xf32>,
    %c0_26 = arith.constant 0 : index
    %c12 = arith.constant 12 : index
    %c0_27 = arith.constant 0 : index
    %44 = vector.load %arg6[%c0_26, %c12, %c0_27] : memref<1x17x512xf32, #tpu.memory_space<vmem>>, vector<1x1x512xf32>
    %45 = vector.shape_cast %44 : vector<1x1x512xf32> to vector<1x512xf32>
    %46 = vector.shape_cast %17 : vector<1x512xf32> to vector<1x1x512xf32>
    tpu.vector_store %arg6[%c0_26, %c12, %c0_27], %46 {strides = array<i32>} : memref<1x17x512xf32, #tpu.memory_space<vmem>>, vector<1x1x512xf32>,
    %47 = vector.extract_strided_slice %40 {offsets = [9, 0], sizes = [1, 512], strides = [1, 1]} : vector<12x512xf32> to vector<1x512xf32>
    %48 = vector.extract_strided_slice %40 {offsets = [10, 0], sizes = [1, 512], strides = [1, 1]} : vector<12x512xf32> to vector<1x512xf32>
    %49 = vector.extract_strided_slice %40 {offsets = [11, 0], sizes = [1, 512], strides = [1, 1]} : vector<12x512xf32> to vector<1x512xf32>
    %cst_28 = arith.constant 1.000000e+00 : f32
    %50 = vector.broadcast %cst_28 : f32 to vector<1x512xf32>
    %51 = arith.mulf %47, %48 : vector<1x512xf32>
    %52 = arith.mulf %47, %49 : vector<1x512xf32>
    %53 = arith.mulf %48, %49 : vector<1x512xf32>
    %54 = arith.mulf %47, %47 : vector<1x512xf32>
    %55 = arith.mulf %48, %48 : vector<1x512xf32>
    %56 = arith.subf %54, %55 : vector<1x512xf32>
    %cst_29 = arith.constant 3.000000e+00 : f32
    %57 = vector.broadcast %cst_29 : f32 to vector<1x512xf32>
    %58 = arith.mulf %57, %49 : vector<1x512xf32>
    %59 = arith.mulf %58, %49 : vector<1x512xf32>
    %cst_30 = arith.constant 1.000000e+00 : f32
    %60 = vector.broadcast %cst_30 : f32 to vector<1x512xf32>
    %61 = arith.subf %59, %60 : vector<1x512xf32>
    %cst_31 = arith.constant 0.000000e+00 : f32
    %62 = vector.broadcast %cst_31 : f32 to vector<1x512xf32>
    %63 = arith.index_cast %arg0 : i32 to index
    %c0_32 = arith.constant 0 : index
    %64 = memref.load %arg2[%63, %c0_32] : memref<2x27xf32, #tpu.memory_space<smem>>
    %cst_33 = arith.constant 0.282094806 : f32
    %65 = arith.mulf %cst_33, %64 : f32
    %66 = vector.broadcast %65 : f32 to vector<1x512xf32>
    %67 = arith.mulf %66, %50 : vector<1x512xf32>
    %68 = arith.addf %62, %67 : vector<1x512xf32>
    %69 = arith.index_cast %arg0 : i32 to index
    %c3 = arith.constant 3 : index
    %70 = memref.load %arg2[%69, %c3] : memref<2x27xf32, #tpu.memory_space<smem>>
    %cst_34 = arith.constant 1.02332675 : f32
    %71 = arith.mulf %cst_34, %70 : f32
    %72 = vector.broadcast %71 : f32 to vector<1x512xf32>
    %73 = arith.mulf %72, %47 : vector<1x512xf32>
    %74 = arith.addf %68, %73 : vector<1x512xf32>
    %75 = arith.index_cast %arg0 : i32 to index
    %c6 = arith.constant 6 : index
    %76 = memref.load %arg2[%75, %c6] : memref<2x27xf32, #tpu.memory_space<smem>>
    %cst_35 = arith.constant 1.02332675 : f32
    %77 = arith.mulf %cst_35, %76 : f32
    %78 = vector.broadcast %77 : f32 to vector<1x512xf32>
    %79 = arith.mulf %78, %48 : vector<1x512xf32>
    %80 = arith.addf %74, %79 : vector<1x512xf32>
    %81 = arith.index_cast %arg0 : i32 to index
    %c9 = arith.constant 9 : index
    %82 = memref.load %arg2[%81, %c9] : memref<2x27xf32, #tpu.memory_space<smem>>
    %cst_36 = arith.constant 1.02332675 : f32
    %83 = arith.mulf %cst_36, %82 : f32
    %84 = vector.broadcast %83 : f32 to vector<1x512xf32>
    %85 = arith.mulf %84, %49 : vector<1x512xf32>
    %86 = arith.addf %80, %85 : vector<1x512xf32>
    %87 = arith.index_cast %arg0 : i32 to index
    %c12_37 = arith.constant 12 : index
    %88 = memref.load %arg2[%87, %c12_37] : memref<2x27xf32, #tpu.memory_space<smem>>
    %cst_38 = arith.constant 0.858085513 : f32
    %89 = arith.mulf %cst_38, %88 : f32
    %90 = vector.broadcast %89 : f32 to vector<1x512xf32>
    %91 = arith.mulf %90, %51 : vector<1x512xf32>
    %92 = arith.addf %86, %91 : vector<1x512xf32>
    %93 = arith.index_cast %arg0 : i32 to index
    %c15 = arith.constant 15 : index
    %94 = memref.load %arg2[%93, %c15] : memref<2x27xf32, #tpu.memory_space<smem>>
    %cst_39 = arith.constant 0.858085513 : f32
    %95 = arith.mulf %cst_39, %94 : f32
    %96 = vector.broadcast %95 : f32 to vector<1x512xf32>
    %97 = arith.mulf %96, %52 : vector<1x512xf32>
    %98 = arith.addf %92, %97 : vector<1x512xf32>
    %99 = arith.index_cast %arg0 : i32 to index
    %c18 = arith.constant 18 : index
    %100 = memref.load %arg2[%99, %c18] : memref<2x27xf32, #tpu.memory_space<smem>>
    %cst_40 = arith.constant 0.858085513 : f32
    %101 = arith.mulf %cst_40, %100 : f32
    %102 = vector.broadcast %101 : f32 to vector<1x512xf32>
    %103 = arith.mulf %102, %53 : vector<1x512xf32>
    %104 = arith.addf %98, %103 : vector<1x512xf32>
    %105 = arith.index_cast %arg0 : i32 to index
    %c21 = arith.constant 21 : index
    %106 = memref.load %arg2[%105, %c21] : memref<2x27xf32, #tpu.memory_space<smem>>
    %cst_41 = arith.constant 0.429042757 : f32
    %107 = arith.mulf %cst_41, %106 : f32
    %108 = vector.broadcast %107 : f32 to vector<1x512xf32>
    %109 = arith.mulf %108, %56 : vector<1x512xf32>
    %110 = arith.addf %104, %109 : vector<1x512xf32>
    %111 = arith.index_cast %arg0 : i32 to index
    %c24 = arith.constant 24 : index
    %112 = memref.load %arg2[%111, %c24] : memref<2x27xf32, #tpu.memory_space<smem>>
    %cst_42 = arith.constant 0.247707963 : f32
    %113 = arith.mulf %cst_42, %112 : f32
    %114 = vector.broadcast %113 : f32 to vector<1x512xf32>
    %115 = arith.mulf %114, %61 : vector<1x512xf32>
    %116 = arith.addf %110, %115 : vector<1x512xf32>
    %c0_43 = arith.constant 0 : index
    %c13 = arith.constant 13 : index
    %c0_44 = arith.constant 0 : index
    %117 = vector.load %arg6[%c0_43, %c13, %c0_44] : memref<1x17x512xf32, #tpu.memory_space<vmem>>, vector<1x1x512xf32>
    %118 = vector.shape_cast %117 : vector<1x1x512xf32> to vector<1x512xf32>
    %119 = vector.shape_cast %116 : vector<1x512xf32> to vector<1x1x512xf32>
    tpu.vector_store %arg6[%c0_43, %c13, %c0_44], %119 {strides = array<i32>} : memref<1x17x512xf32, #tpu.memory_space<vmem>>, vector<1x1x512xf32>,
    %cst_45 = arith.constant 0.000000e+00 : f32
    %120 = vector.broadcast %cst_45 : f32 to vector<1x512xf32>
    %121 = arith.index_cast %arg0 : i32 to index
    %c1_46 = arith.constant 1 : index
    %122 = memref.load %arg2[%121, %c1_46] : memref<2x27xf32, #tpu.memory_space<smem>>
    %cst_47 = arith.constant 0.282094806 : f32
    %123 = arith.mulf %cst_47, %122 : f32
    %124 = vector.broadcast %123 : f32 to vector<1x512xf32>
    %125 = arith.mulf %124, %50 : vector<1x512xf32>
    %126 = arith.addf %120, %125 : vector<1x512xf32>
    %127 = arith.index_cast %arg0 : i32 to index
    %c4 = arith.constant 4 : index
    %128 = memref.load %arg2[%127, %c4] : memref<2x27xf32, #tpu.memory_space<smem>>
    %cst_48 = arith.constant 1.02332675 : f32
    %129 = arith.mulf %cst_48, %128 : f32
    %130 = vector.broadcast %129 : f32 to vector<1x512xf32>
    %131 = arith.mulf %130, %47 : vector<1x512xf32>
    %132 = arith.addf %126, %131 : vector<1x512xf32>
    %133 = arith.index_cast %arg0 : i32 to index
    %c7 = arith.constant 7 : index
    %134 = memref.load %arg2[%133, %c7] : memref<2x27xf32, #tpu.memory_space<smem>>
    %cst_49 = arith.constant 1.02332675 : f32
    %135 = arith.mulf %cst_49, %134 : f32
    %136 = vector.broadcast %135 : f32 to vector<1x512xf32>
    %137 = arith.mulf %136, %48 : vector<1x512xf32>
    %138 = arith.addf %132, %137 : vector<1x512xf32>
    %139 = arith.index_cast %arg0 : i32 to index
    %c10 = arith.constant 10 : index
    %140 = memref.load %arg2[%139, %c10] : memref<2x27xf32, #tpu.memory_space<smem>>
    %cst_50 = arith.constant 1.02332675 : f32
    %141 = arith.mulf %cst_50, %140 : f32
    %142 = vector.broadcast %141 : f32 to vector<1x512xf32>
    %143 = arith.mulf %142, %49 : vector<1x512xf32>
    %144 = arith.addf %138, %143 : vector<1x512xf32>
    %145 = arith.index_cast %arg0 : i32 to index
    %c13_51 = arith.constant 13 : index
    %146 = memref.load %arg2[%145, %c13_51] : memref<2x27xf32, #tpu.memory_space<smem>>
    %cst_52 = arith.constant 0.858085513 : f32
    %147 = arith.mulf %cst_52, %146 : f32
    %148 = vector.broadcast %147 : f32 to vector<1x512xf32>
    %149 = arith.mulf %148, %51 : vector<1x512xf32>
    %150 = arith.addf %144, %149 : vector<1x512xf32>
    %151 = arith.index_cast %arg0 : i32 to index
    %c16 = arith.constant 16 : index
    %152 = memref.load %arg2[%151, %c16] : memref<2x27xf32, #tpu.memory_space<smem>>
    %cst_53 = arith.constant 0.858085513 : f32
    %153 = arith.mulf %cst_53, %152 : f32
    %154 = vector.broadcast %153 : f32 to vector<1x512xf32>
    %155 = arith.mulf %154, %52 : vector<1x512xf32>
    %156 = arith.addf %150, %155 : vector<1x512xf32>
    %157 = arith.index_cast %arg0 : i32 to index
    %c19 = arith.constant 19 : index
    %158 = memref.load %arg2[%157, %c19] : memref<2x27xf32, #tpu.memory_space<smem>>
    %cst_54 = arith.constant 0.858085513 : f32
    %159 = arith.mulf %cst_54, %158 : f32
    %160 = vector.broadcast %159 : f32 to vector<1x512xf32>
    %161 = arith.mulf %160, %53 : vector<1x512xf32>
    %162 = arith.addf %156, %161 : vector<1x512xf32>
    %163 = arith.index_cast %arg0 : i32 to index
    %c22 = arith.constant 22 : index
    %164 = memref.load %arg2[%163, %c22] : memref<2x27xf32, #tpu.memory_space<smem>>
    %cst_55 = arith.constant 0.429042757 : f32
    %165 = arith.mulf %cst_55, %164 : f32
    %166 = vector.broadcast %165 : f32 to vector<1x512xf32>
    %167 = arith.mulf %166, %56 : vector<1x512xf32>
    %168 = arith.addf %162, %167 : vector<1x512xf32>
    %169 = arith.index_cast %arg0 : i32 to index
    %c25 = arith.constant 25 : index
    %170 = memref.load %arg2[%169, %c25] : memref<2x27xf32, #tpu.memory_space<smem>>
    %cst_56 = arith.constant 0.247707963 : f32
    %171 = arith.mulf %cst_56, %170 : f32
    %172 = vector.broadcast %171 : f32 to vector<1x512xf32>
    %173 = arith.mulf %172, %61 : vector<1x512xf32>
    %174 = arith.addf %168, %173 : vector<1x512xf32>
    %c0_57 = arith.constant 0 : index
    %c14 = arith.constant 14 : index
    %c0_58 = arith.constant 0 : index
    %175 = vector.load %arg6[%c0_57, %c14, %c0_58] : memref<1x17x512xf32, #tpu.memory_space<vmem>>, vector<1x1x512xf32>
    %176 = vector.shape_cast %175 : vector<1x1x512xf32> to vector<1x512xf32>
    %177 = vector.shape_cast %174 : vector<1x512xf32> to vector<1x1x512xf32>
    tpu.vector_store %arg6[%c0_57, %c14, %c0_58], %177 {strides = array<i32>} : memref<1x17x512xf32, #tpu.memory_space<vmem>>, vector<1x1x512xf32>,
    %cst_59 = arith.constant 0.000000e+00 : f32
    %178 = vector.broadcast %cst_59 : f32 to vector<1x512xf32>
    %179 = arith.index_cast %arg0 : i32 to index
    %c2_60 = arith.constant 2 : index
    %180 = memref.load %arg2[%179, %c2_60] : memref<2x27xf32, #tpu.memory_space<smem>>
    %cst_61 = arith.constant 0.282094806 : f32
    %181 = arith.mulf %cst_61, %180 : f32
    %182 = vector.broadcast %181 : f32 to vector<1x512xf32>
    %183 = arith.mulf %182, %50 : vector<1x512xf32>
    %184 = arith.addf %178, %183 : vector<1x512xf32>
    %185 = arith.index_cast %arg0 : i32 to index
    %c5 = arith.constant 5 : index
    %186 = memref.load %arg2[%185, %c5] : memref<2x27xf32, #tpu.memory_space<smem>>
    %cst_62 = arith.constant 1.02332675 : f32
    %187 = arith.mulf %cst_62, %186 : f32
    %188 = vector.broadcast %187 : f32 to vector<1x512xf32>
    %189 = arith.mulf %188, %47 : vector<1x512xf32>
    %190 = arith.addf %184, %189 : vector<1x512xf32>
    %191 = arith.index_cast %arg0 : i32 to index
    %c8 = arith.constant 8 : index
    %192 = memref.load %arg2[%191, %c8] : memref<2x27xf32, #tpu.memory_space<smem>>
    %cst_63 = arith.constant 1.02332675 : f32
    %193 = arith.mulf %cst_63, %192 : f32
    %194 = vector.broadcast %193 : f32 to vector<1x512xf32>
    %195 = arith.mulf %194, %48 : vector<1x512xf32>
    %196 = arith.addf %190, %195 : vector<1x512xf32>
    %197 = arith.index_cast %arg0 : i32 to index
    %c11 = arith.constant 11 : index
    %198 = memref.load %arg2[%197, %c11] : memref<2x27xf32, #tpu.memory_space<smem>>
    %cst_64 = arith.constant 1.02332675 : f32
    %199 = arith.mulf %cst_64, %198 : f32
    %200 = vector.broadcast %199 : f32 to vector<1x512xf32>
    %201 = arith.mulf %200, %49 : vector<1x512xf32>
    %202 = arith.addf %196, %201 : vector<1x512xf32>
    %203 = arith.index_cast %arg0 : i32 to index
    %c14_65 = arith.constant 14 : index
    %204 = memref.load %arg2[%203, %c14_65] : memref<2x27xf32, #tpu.memory_space<smem>>
    %cst_66 = arith.constant 0.858085513 : f32
    %205 = arith.mulf %cst_66, %204 : f32
    %206 = vector.broadcast %205 : f32 to vector<1x512xf32>
    %207 = arith.mulf %206, %51 : vector<1x512xf32>
    %208 = arith.addf %202, %207 : vector<1x512xf32>
    %209 = arith.index_cast %arg0 : i32 to index
    %c17 = arith.constant 17 : index
    %210 = memref.load %arg2[%209, %c17] : memref<2x27xf32, #tpu.memory_space<smem>>
    %cst_67 = arith.constant 0.858085513 : f32
    %211 = arith.mulf %cst_67, %210 : f32
    %212 = vector.broadcast %211 : f32 to vector<1x512xf32>
    %213 = arith.mulf %212, %52 : vector<1x512xf32>
    %214 = arith.addf %208, %213 : vector<1x512xf32>
    %215 = arith.index_cast %arg0 : i32 to index
    %c20 = arith.constant 20 : index
    %216 = memref.load %arg2[%215, %c20] : memref<2x27xf32, #tpu.memory_space<smem>>
    %cst_68 = arith.constant 0.858085513 : f32
    %217 = arith.mulf %cst_68, %216 : f32
    %218 = vector.broadcast %217 : f32 to vector<1x512xf32>
    %219 = arith.mulf %218, %53 : vector<1x512xf32>
    %220 = arith.addf %214, %219 : vector<1x512xf32>
    %221 = arith.index_cast %arg0 : i32 to index
    %c23 = arith.constant 23 : index
    %222 = memref.load %arg2[%221, %c23] : memref<2x27xf32, #tpu.memory_space<smem>>
    %cst_69 = arith.constant 0.429042757 : f32
    %223 = arith.mulf %cst_69, %222 : f32
    %224 = vector.broadcast %223 : f32 to vector<1x512xf32>
    %225 = arith.mulf %224, %56 : vector<1x512xf32>
    %226 = arith.addf %220, %225 : vector<1x512xf32>
    %227 = arith.index_cast %arg0 : i32 to index
    %c26 = arith.constant 26 : index
    %228 = memref.load %arg2[%227, %c26] : memref<2x27xf32, #tpu.memory_space<smem>>
    %cst_70 = arith.constant 0.247707963 : f32
    %229 = arith.mulf %cst_70, %228 : f32
    %230 = vector.broadcast %229 : f32 to vector<1x512xf32>
    %231 = arith.mulf %230, %61 : vector<1x512xf32>
    %232 = arith.addf %226, %231 : vector<1x512xf32>
    %c0_71 = arith.constant 0 : index
    %c15_72 = arith.constant 15 : index
    %c0_73 = arith.constant 0 : index
    %233 = vector.load %arg6[%c0_71, %c15_72, %c0_73] : memref<1x17x512xf32, #tpu.memory_space<vmem>>, vector<1x1x512xf32>
    %234 = vector.shape_cast %233 : vector<1x1x512xf32> to vector<1x512xf32>
    %235 = vector.shape_cast %232 : vector<1x512xf32> to vector<1x1x512xf32>
    tpu.vector_store %arg6[%c0_71, %c15_72, %c0_73], %235 {strides = array<i32>} : memref<1x17x512xf32, #tpu.memory_space<vmem>>, vector<1x1x512xf32>,
    %236 = vector.extract_strided_slice %40 {offsets = [5, 0], sizes = [1, 512], strides = [1, 1]} : vector<12x512xf32> to vector<1x512xf32>
    %cst_74 = arith.constant -5.000000e-02 : f32
    %237 = vector.broadcast %cst_74 : f32 to vector<1x512xf32>
    %238 = arith.cmpf olt, %236, %237 : vector<1x512xf32>
    %239 = arith.extui %238 : vector<1x512xi1> to vector<1x512xi32>
    %240 = arith.sitofp %239 : vector<1x512xi32> to vector<1x512xf32>
    %c0_75 = arith.constant 0 : index
    %c16_76 = arith.constant 16 : index
    %c0_77 = arith.constant 0 : index
    %241 = vector.load %arg6[%c0_75, %c16_76, %c0_77] : memref<1x17x512xf32, #tpu.memory_space<vmem>>, vector<1x1x512xf32>
    %242 = vector.shape_cast %241 : vector<1x1x512xf32> to vector<1x512xf32>
    %243 = vector.shape_cast %240 : vector<1x512xf32> to vector<1x1x512xf32>
    tpu.vector_store %arg6[%c0_75, %c16_76, %c0_77], %243 {strides = array<i32>} : memref<1x17x512xf32, #tpu.memory_space<vmem>>, vector<1x1x512xf32>,
    return
  }
  func.func @transform_0(%arg0: i32, %arg1: i32) -> (i32, i32) {
    %c0_i32 = arith.constant 0 : i32
    %c0_i32_0 = arith.constant 0 : i32
    %c0_i32_1 = arith.constant 0 : i32
    return %c0_i32, %c0_i32_0 : i32, i32
  }
  func.func @transform_1(%arg0: i32, %arg1: i32) -> (i32, i32) {
    %c0_i32 = arith.constant 0 : i32
    %c0_i32_0 = arith.constant 0 : i32
    return %c0_i32, %arg1 : i32, i32
  }
  func.func @transform_2(%arg0: i32, %arg1: i32) -> (i32, i32, i32) {
    %c0_i32 = arith.constant 0 : i32
    %c0_i32_0 = arith.constant 0 : i32
    %c0_i32_1 = arith.constant 0 : i32
    return %arg0, %c0_i32, %c0_i32_0 : i32, i32, i32
  }
  func.func @transform_3(%arg0: i32, %arg1: i32) -> (i32, i32, i32, i32) {
    %c0_i32 = arith.constant 0 : i32
    %c0_i32_0 = arith.constant 0 : i32
    %c0_i32_1 = arith.constant 0 : i32
    %c0_i32_2 = arith.constant 0 : i32
    return %arg0, %c0_i32, %c0_i32_0, %c0_i32_1 : i32, i32, i32, i32
  }
  func.func @transform_4(%arg0: i32, %arg1: i32) -> (i32, i32, i32) {
    %c0_i32 = arith.constant 0 : i32
    %c0_i32_0 = arith.constant 0 : i32
    return %arg0, %c0_i32, %arg1 : i32, i32, i32
  }
}

</mosaic_0001>

<bundles_post_ra>
// kernel: tpu_custom_call.1
= control target key start
LH: loop header
LB: loop body
LE: loop exit
PB: predicated region body
PF: predicated region fallthrough
CT: control target
= control target key end

     0   :  { %s3919_s0 = inlined_call_operand.vmem [shape: f32[2,27], index: 0, kind: input, shape index: {}]   ;;  %s3920_s1 = inlined_call_operand.vmem [shape: f32[2,1024], index: 1, kind: input, shape index: {}]   ;;  %s3921_s2 = inlined_call_operand.vmem [shape: f32[2,32,16], index: 2, kind: input, shape index: {}]   ;;  %s3922_s3 = inlined_call_operand.vmem [shape: f32[2,3,12,32], index: 3, kind: input, shape index: {}]   ;;  %s3923_s4 = inlined_call_operand.vmem [shape: f32[2,17,1024], index: 4, kind: output, shape index: {}]  }
   0x1   :  { %3962 = sst [smem:[#allocation38_spill]] %s3919_s0 }
   0x2   :  { %3963 = sst [smem:[#allocation39_spill]] %s3920_s1 }
   0x3   :  { %3964 = sst [smem:[#allocation40_spill]] %s3921_s2 }
   0x4   :  { %3965 = sst [smem:[#allocation41_spill]] %s3922_s3 }
   0x5   :  { %3966 = sst [smem:[#allocation42_spill]] %s3923_s4 }
   0x6   :  { %9 = vsyncpa [#allocation3], 0  ;;  %s2532_s15 = smov 0   ;;  %s2534_s16 = smov 0  }
   0x7   :  { %s2536_s17 = smov 0   ;;  %s2538_s18 = smov 0  }
   0x8   :  { %s2540_s19 = smov 0   ;;  %s2542_s20 = smov 0  }
   0x9   :  { %s2544_s21 = smov 0  }
   0xa LB: > { %3967 = sst [smem:[#allocation6_spill]] %s2386_s16  ;;  %s1902_s22 = sadd.s32 4294967295, %s2406_s21   ;;  %s2406_s21 = sphi %s2544_s21, %s15_s21   ;;  %s2402_s20 = sphi %s2542_s20, %s4142_s20   ;;  %s2398_s19 = sphi %s2540_s19, %s4141_s19   ;;  %s2394_s18 = sphi %s2538_s18, %s4140_s18   ;;  %s2390_s17 = sphi %s2536_s17, %s4139_s17   ;;  %s2386_s16 = sphi %s2534_s16, %s4138_s16   ;;  %s2382_s15 = sphi %s2532_s15, %s4137_s15  }
   0xb   : > { %3968 = sst [smem:[#allocation7_spill]] %s2394_s18  ;;  %s24_s23 = sadd.s32 1, %s2398_s19 }
   0xc   : > { %3969 = sst [smem:[#allocation8_spill]] %s2398_s19  ;;  %p25_p0 = scmp.ge.s32.totalorder %s24_s23, 2 }
   0xd   : > { %3970 = sst [smem:[#allocation9_spill]] %s2402_s20  ;;  %s27_s24 = sadd.s32 1, %s2402_s20 }
   0xe   : > { %3971 = sst [smem:[#allocation10_spill]] %s2406_s21  ;;  %s135_s25 = sadd.s32 1, %s2386_s16 }
   0xf   : > { %p145_p1 = scmp.ne.s32.totalorder %s2386_s16, %s2382_s15  ;;  %s4144_s23 = smov (%p25_p0, %s24_s23), 0 }
  0x10   : > { %3972 = sst [smem:[#allocation11_spill]] %s4144_s23  ;;  %s4146_s24 = smov (!%p25_p0, %s27_s24), %s2402_s20 }
  0x11   : > { %s131_s26 = ssub.s32 %s2398_s19, %s4144_s23  ;;  %p146_p2 = scmp.eq.s32.totalorder %s1902_s22, 3 }
  0x12   : > { %p29_p3 = scmp.ge.s32.totalorder %s4146_s24, 2  ;;  %p1904_p4 = scmp.ge.s32.totalorder %s2406_s21, 1 }
  0x13   : > { %p2579_p5 = por %p146_p2, %p145_p1  ;;  %p159_p6 = scmp.lt.s32.totalorder %s2406_s21, 5 }
  0x14   : > { %s4148_s24 = smov (%p29_p3, %s4146_s24), 0  ;;  %p1994_p8 = scmp.eq.s32.totalorder %s1902_s22, 0 }
  0x15   : > { %s3973_s27 = scalar_select %p2579_p5, 1, 0 }
  0x16   : > { %3975 = sst [smem:[#allocation13_spill]] %s4148_s24  ;;  %p160_p7 = pnand %p1904_p4, %p159_p6 }
  0x17   : > { %3974 = sst [smem:[#allocation12_spill]] %s3973_s27  ;;  %s130_s28 = ssub.s32 %s2402_s20, %s4148_s24 }
  0x18   : > { %s132_s29 = sor.u32 %s131_s26, %s130_s28  ;;  %p1990_p9 = pneg %p160_p7 }
  0x19   : > { %p133_p10 = scmp.eq.s32.totalorder %s132_s29, 0  ;;  %s3976_s0 = sld [smem:[#allocation38_spill]] }
  0x1a   : > { %p1991_p11 = pnand %p1994_p8, %p1990_p9  ;;  %s2492_s8 = smov [#allocation2]  }
  0x1b   : > { %s2592_s7 = scalar_select %p133_p10, %s2386_s16, %s135_s25  }
  0x1c   : > { %209 = sbr.rel (%p160_p7) target bundleno = 595 (0x253), region = 36 }
  0x1d   : > { %3977 = sst [smem:[#allocation14_spill]] %s2592_s7 }
  0x1f   : > { %s171_s6 = sshll.u32 %s3976_s0, 4  ;;  %s172_s6 = int_to_ptr.vmem [resolvable:$true] %s171_s6 }
  0x20   : > { %1993 = dma.vmem_to_smem (!%p1991_p11), %s172_s6, 32, %s2492_s8, [#allocation3]  }
  0x21   : > { %2377 = dma.done.wait (%p1994_p8), [#allocation3], 32  }
  0x22   : > { %2379 = vsyncadd (%p1994_p8), [#allocation3], 4294967264 }
  0x23   : > { %216 = sfence }
  0x24   : > { %s243_s9 = sand.u32 1, %s2382_s15   ;;  %s2596_s10 = sshll.u32 %s2390_s17, 2  ;;  %v3924_v0 = vlaneseq  ;;  %v2636_v12 = vmov 0.0   ;;  %v2638_v13 = vmov 0.0   ;;  %v2640_v14 = vmov 0.0  }
  0x25   : > { %3978 = sst [smem:[#allocation15_spill]] %s2596_s10  ;;  %s1983_s11 = smul.u32 96, %s243_s9  ;;  %v2642_v15 = vmov 0.0   ;;  %v2644_v16 = vmov 0.0   ;;  %v2646_v17 = vmov 0.0   ;;  %v2648_v18 = vmov 0.0  }
  0x26   : > { %p247_p12 = scmp.lt.s32.totalorder %s2596_s10, 7  ;;  %p252_p13 = scmp.lt.s32.totalorder %s2394_s18, 1  ;;  %v2601_v1 = vshrl.u32 %v3924_v0, 7  ;;  %v2650_v19 = vmov 0.0   ;;  %v2652_v20 = vmov 0.0   ;;  %v2654_v21 = vmov 0.0  }
  0x27   : > { %s3980_s1 = sld [smem:[#allocation39_spill]]  ;;  %s2634_s9 = scalar_lea.vmem [#allocation4], %s1983_s11  ;;  %v2656_v22 = vmov 0.0   ;;  %v2658_v23 = vmov 0.0   ;;  %v2660_v24 = vmov -1.0   ;;  %v2662_v25 = vmov -1.0  }
  0x28   : > { %3979 = vst [vmem:[#allocation16_spill] sm:$0xff] %v2601_v1  ;;  %s248_s12 = scalar_select %p247_p12, %s2596_s10, 7  ;;  %v2664_v26 = vmov -1.0   ;;  %v2666_v27 = vmov -1.0   ;;  %v2668_v28 = vmov 1e+10  }
  0x29   : > { %s253_s13 = scalar_select %p252_p13, %s2394_s18, 1  ;;  %v2670_v29 = vmov 1e+10   ;;  %v2672_v30 = vmov 1e+10  }
  0x2a   : > { %s1910_s14 = sshll.u32 %s248_s12, 1  ;;  %s3981_s2 = sld [smem:[#allocation40_spill]]  ;;  %v2674_v31 = vmov 1e+10  }
  0x2b   : > { %s1982_s28 = sshll.u32 %s253_s13, 5  ;;  %s1984_s30 = smul.u32 48, %s253_s13 }
  0x2c   : > { %s3985_s3 = sld [smem:[#allocation41_spill]]  ;;  %s2676_s11 = smov 0  }
  0x2d   : > { %s250_s26 = scalar_lea.vmem %s3980_s1, %s1910_s14 }
  0x2e   : > { %v263_v2 = vld [vmem:[%s250_s26] ss:$2 sm:$0xf]  ;;  %v1914_v3 = vld [vmem:[%s250_s26 + $0x1] ss:$2 sm:$0xf] }
  0x2f   : > { %v2613_v4 = vperm.slane %v263_v2, 0  ;;  %v2615_v5 = vperm.slane %v263_v2, 1  ;;  %v2617_v6 = vperm.slane %v263_v2, 2  ;;  %v2624_v7 = vperm.slane %v263_v2, 3 }
  0x30   : > { %s2611_s29 = scalar_lea.vmem %s3981_s2, %s1982_s28  ;;  %v2626_v8 = vperm.slane %v1914_v3, 0  ;;  %v2628_v9 = vperm.slane %v1914_v3, 1  ;;  %v2630_v10 = vperm.slane %v1914_v3, 2  ;;  %v2632_v11 = vperm.slane %v1914_v3, 3 }
  0x31   : > { %3982 = vst [vmem:[#allocation17_spill] sm:$0xff] %v2613_v4 }
  0x32   : > { %3983 = vst [vmem:[#allocation18_spill] sm:$0xff] %v2615_v5  ;;  %s2622_s8 = scalar_lea.vmem %s3985_s3, %s1984_s30 }
  0x33   : > { %3984 = vst [vmem:[#allocation19_spill] sm:$0xff] %v2617_v6 }
  0x34   : > { %3986 = vst [vmem:[#allocation20_spill] sm:$0xff] %v2624_v7 }
  0x35   : > { %3987 = vst [vmem:[#allocation21_spill] sm:$0xff] %v2626_v8 }
  0x36   : > { %3988 = vst [vmem:[#allocation22_spill] sm:$0xff] %v2628_v9 }
  0x37   : > { %3989 = vst [vmem:[#allocation23_spill] sm:$0xff] %v2630_v10 }
  0x38   : > { %3990 = vst [vmem:[#allocation24_spill] sm:$0xff] %v2632_v11 }
  0x39 LB: >> { %v3997_v5 = vld [vmem:[#allocation18_spill] sm:$0xff]  ;;  %v3998_v4 = vld [vmem:[#allocation17_spill] sm:$0xff]  ;;  %3999 = vst [vmem:[#allocation25_spill] sm:$0xff] %v2474_v28  ;;  %v2493_v32 = vmov 3   ;;  %v2494_v33 = vmov 0   ;;  %s1915_s12 = sshll.u32 %s2490_s11, 3  ;;  %v2438_v19 = vphi %v2650_v19, %v4067_v19   ;;  %v2434_v18 = vphi %v2648_v18, %v4066_v18   ;;  %v2430_v17 = vphi %v2646_v17, %v4065_v17   ;;  %v2426_v16 = vphi %v2644_v16, %v4064_v16   ;;  %v2422_v15 = vphi %v2642_v15, %v4063_v15   ;;  %v2418_v14 = vphi %v2640_v14, %v4062_v14   ;;  %v2414_v13 = vphi %v2638_v13, %v4061_v13   ;;  %v2410_v12 = vphi %v2636_v12, %v4060_v12   ;;  %s2490_s11 = sphi %s2676_s11, %s291_s11   ;;  %v2486_v31 = vphi %v2674_v31, %v4086_v31   ;;  %v2482_v30 = vphi %v2672_v30, %v4083_v30   ;;  %v2478_v29 = vphi %v2670_v29, %v4080_v29   ;;  %v2474_v28 = vphi %v2668_v28, %v4077_v28   ;;  %v2470_v27 = vphi %v2666_v27, %v4075_v27   ;;  %v2466_v26 = vphi %v2664_v26, %v4074_v26   ;;  %v2462_v25 = vphi %v2662_v25, %v4073_v25   ;;  %v2458_v24 = vphi %v2660_v24, %v4072_v24   ;;  %v2454_v23 = vphi %v2658_v23, %v4071_v23   ;;  %v2450_v22 = vphi %v2656_v22, %v4070_v22   ;;  %v2446_v21 = vphi %v2654_v21, %v4069_v21   ;;  %v2442_v20 = vphi %v2652_v20, %v4068_v20  }
  0x3a   : >> { %v3996_v6 = vld [vmem:[#allocation19_spill] sm:$0xff]  ;;  %4000 = vst [vmem:[#allocation26_spill] sm:$0xff] %v2478_v29  ;;  %2237 = vset.pattern.permute.xlu1 %v2493_v32  ;;  %2235 = vset.pattern.permute.xlu0 %v2494_v33  ;;  %v2495_v34 = vmov 6   ;;  %s313_s13 = scalar_lea.vmem %s2611_s29, %s1915_s12  ;;  %v2496_v36 = vmov 4   ;;  %v2497_v37 = vmov 1   ;;  %v2498_v38 = vmov 7  }
  0x3b   : >> { %v3995_v7 = vld [vmem:[#allocation20_spill] sm:$0xff]  ;;  %4001 = vst [vmem:[#allocation27_spill] sm:$0xff] %v2482_v30  ;;  %2239 = vset.pattern.permute.xlu2 %v2495_v34  ;;  %v314_v35 = vld [vmem:[%s313_s13] sm:$0xff]  ;;  %v2499_v39 = vmov 2   ;;  %v2500_v40 = vmov 8   ;;  %v2501_v41 = vmov 5  }
  0x3c   : >> { %v3994_v8 = vld [vmem:[#allocation21_spill] sm:$0xff]  ;;  %4002 = vst [vmem:[#allocation28_spill] sm:$0xff] %v2486_v31  ;;  %345 = vperm.xlu1 %2237, %v314_v35   ;;  %317 = vperm.xlu0 %2235, %v314_v35   ;;  %v2502_v42 = vmov 9   ;;  %v2503_v43 = vmov 12   ;;  %v2504_v44 = vmov 10   ;;  %vm460_vm0 = vcmp.gt.f32.partialorder %v314_v35, 0.5 }
  0x3d   : >> { %v3993_v9 = vld [vmem:[#allocation22_spill] sm:$0xff]  ;;  %373 = vperm.xlu2 %2239, %v314_v35   ;;  %v461_v45 = vsel %vm460_vm0, 1, %v2494_v33  ;;  %v2505_v46 = vmov 11   ;;  %v4015_v1 = vld [vmem:[#allocation16_spill] sm:$0xff]  ;;  %s291_s11 = sadd.s32 1, %s2490_s11  }
  0x3e   : >> { %v3992_v10 = vld [vmem:[#allocation23_spill] sm:$0xff]  ;;  %p3107_p0 = scmp.ge.s32.totalorder %s291_s11, 4  }
  0x3f   : >> { %v3991_v11 = vld [vmem:[#allocation24_spill] sm:$0xff]  ;;  %s3404_s22 = sshll.u32 (%p3107_p0), %s2394_s18, 7 }
  0x40   : > { %s1173_s25 = sadd.s32 (%p3107_p0), 3, %s3404_s22  ;;  %s1185_s26 = sadd.s32 (%p3107_p0), 6, %s3404_s22 }
  0x41   : > { %s3408_s28 = sld [smem:[#allocation2 + %s1173_s25]] (%p3107_p0)  ;;  %s1209_s15 = sadd.s32 (%p3107_p0), 9, %s3404_s22 }
  0x42   : > { %s3411_s17 = sld [smem:[#allocation2 + %s1185_s26]] (%p3107_p0)  ;;  %s1233_s5 = sadd.s32 (%p3107_p0), 12, %s3404_s22 }
  0x43   : > { %s3414_s29 = sld [smem:[#allocation2 + %s3404_s22]] (%p3107_p0)  ;;  %s1245_s6 = sadd.s32 (%p3107_p0), 15, %s3404_s22 }
  0x44   : >> { %2238 = vset.pattern.permute.xlu1 %v2496_v36  ;;  %2236 = vset.pattern.permute.xlu0 %v2497_v37  ;;  %s3420_s30 = sld [smem:[#allocation2 + %s1209_s15]] (%p3107_p0)  ;;  %s1281_s26 = sadd.s32 (%p3107_p0), 21, %s3404_s22 }
  0x45   : >> { %353 = vperm.xlu1 %2238, %v314_v35   ;;  %325 = vperm.xlu0 %2236, %v314_v35   ;;  %s3425_s11 = sld [smem:[#allocation2 + %s1233_s5]] (%p3107_p0)  ;;  %s1293_s1 = sadd.s32 (%p3107_p0), 24, %s3404_s22 }
  0x46   : >> { %2240 = vset.pattern.permute.xlu2 %v2498_v38  ;;  %s3429_s14 = sld [smem:[#allocation2 + %s1245_s6]] (%p3107_p0)  ;;  %s1336_s5 = sadd.s32 (%p3107_p0), 4, %s3404_s22 }
  0x47   : >> { %381 = vperm.xlu2 %2240, %v314_v35   ;;  %s3449_s13 = sld [smem:[#allocation2 + %s1293_s1]] (%p3107_p0)  ;;  %s1348_s0 = sadd.s32 (%p3107_p0), 7, %s3404_s22 }
  0x48   : > { %s1372_s3 = sadd.s32 (%p3107_p0), 10, %s3404_s22  ;;  %s3456_s24 = sld [smem:[#allocation2 + %s1336_s5]] (%p3107_p0) }
  0x49   : > { %s3458_s23 = sld [smem:[#allocation2 + %s1348_s0]] (%p3107_p0)  ;;  %s1396_s6 = sadd.s32 (%p3107_p0), 13, %s3404_s22 }
  0x4a   : > { %s3462_s1 = sld [smem:[#allocation2 + %s1372_s3]] (%p3107_p0)  ;;  %s1408_s5 = sadd.s32 (%p3107_p0), 16, %s3404_s22 }
  0x4b   : > { %s3476_s3 = sld [smem:[#allocation2 + %s1408_s5]] (%p3107_p0)  ;;  %s1444_s7 = sadd.s32 (%p3107_p0), 22, %s3404_s22 }
  0x4c   : > { %s1456_s4 = sadd.s32 (%p3107_p0), 25, %s3404_s22  ;;  %s3485_s10 = sld [smem:[#allocation2 + %s1444_s7]] (%p3107_p0) }
  0x4d   : >> { %2241 = vset.pattern.permute.xlu1 %v2499_v39  ;;  %2243 = vset.pattern.permute.xlu0 %v2500_v40  ;;  %4088 = sst [smem:[#allocation34_spill]] (%p3107_p0), %s3449_s13  ;;  %s1499_s15 = sadd.s32 (%p3107_p0), 5, %s3404_s22 }
  0x4e   : >> { %337 = vperm.xlu1 %2241, %v314_v35   ;;  %393 = vperm.xlu0 %2243, %v314_v35   ;;  %s3489_s0 = sld [smem:[#allocation2 + %s1456_s4]] (%p3107_p0)  ;;  %s1494_s16 = sadd.s32 (%p3107_p0), 2, %s3404_s22 }
  0x4f   : >> { %2242 = vset.pattern.permute.xlu2 %v2501_v41  ;;  %s3492_s19 = sld [smem:[#allocation2 + %s1499_s15]] (%p3107_p0)  ;;  %s1535_s20 = sadd.s32 (%p3107_p0), 11, %s3404_s22 }
  0x50   : >> { %365 = vperm.xlu2 %2242, %v314_v35   ;;  %s3497_s7 = sld [smem:[#allocation2 + %s1494_s16]] (%p3107_p0)  ;;  %s1559_s18 = sadd.s32 (%p3107_p0), 14, %s3404_s22 }
  0x51   : > { %s1571_s13 = sadd.s32 (%p3107_p0), 17, %s3404_s22  ;;  %s3507_s15 = sld [smem:[#allocation2 + %s1559_s18]] (%p3107_p0) }
  0x52   : > { %4091 = sst [smem:[#allocation36_spill]] (%p3107_p0), %s3485_s10  ;;  %s4096_s5 = smul.f32 (%p3107_p0), 1.0233268, %s3408_s28 }
  0x53   : > { %s3515_s16 = sld [smem:[#allocation2 + %s1571_s13]] (%p3107_p0)  ;;  %s1619_s21 = sadd.s32 (%p3107_p0), 26, %s3404_s22 }
  0x54   : > { %4092 = sst [smem:[#allocation37_spill]] (%p3107_p0), %s3489_s0  ;;  %s4097_s18 = smul.f32 (%p3107_p0), 1.0233268, %s3411_s17 }
  0x55   : > { %s1501_s4 = smul.f32 (%p3107_p0), 1.0233268, %s3492_s19 }
  0x56   : >> { %2244 = vset.pattern.permute.xlu1 %v2502_v42  ;;  %2248 = vset.pattern.permute.xlu0 %v2503_v43  ;;  %s4098_s0 = smul.f32 (%p3107_p0), 1.0233268, %s3420_s30 }
  0x57   : >> { %401 = vperm.xlu1 %2244, %v314_v35   ;;  %s4099_s10 = smul.f32 (%p3107_p0), 1.0233268, %s3456_s24 }
  0x58   : >> { %2245 = vset.pattern.permute.xlu2 %v2504_v44  ;;  %s1496_s19 = smul.f32 (%p3107_p0), 0.2820948, %s3497_s7 }
  0x59   : >> { %409 = vperm.xlu2 %2245, %v314_v35   ;;  %s4102_s17 = smul.f32 (%p3107_p0), 1.0233268, %s3458_s23 }
  0x5a   : > { %s4103_s24 = smul.f32 (%p3107_p0), 0.8580855, %s3425_s11 }
  0x5b   : > { %s1561_s11 = smul.f32 (%p3107_p0), 0.8580855, %s3507_s15 }
  0x5f   : >> { %2246 = vset.pattern.permute.xlu1 %v2505_v46 }
  0x60   : >> { %421 = vperm.xlu1 %2246, %v314_v35  }
  0x61   : >> { %2247 = vset.pattern.permute.xlu2 %v2503_v43 }
  0x62   : >> { %463 = vperm.xlu2 %2247, %v461_v45  }
  0x97   : >> { %v374_v47 = vpop.permute.xlu2 %373 }
  0x98   : >> { %v376_v54 = vmul.f32 %v374_v47, %v3998_v4  ;;  %v377_v62 = vmul.f32 %v374_v47, %v3997_v5  ;;  %v378_v63 = vmul.f32 %v374_v47, %v3996_v6  ;;  %v379_v44 = vmul.f32 %v374_v47, %v3995_v7 }
  0xa1   : >> { %v382_v49 = vpop.permute.xlu2 %381 }
  0xa2   : >> { %v384_v45 = vmul.f32 %v382_v49, %v3994_v8  ;;  %v385_v46 = vmul.f32 %v382_v49, %v3993_v9 }
  0xa4   : >> { %v388_v0 = vadd.f32 %v384_v45, %v376_v54 }
  0xaa   : >> { %v366_v52 = vpop.permute.xlu2 %365 }
  0xae   : >> { %v346_v48 = vpop.permute.xlu1 %345  ;;  %v318_v50 = vpop.permute.xlu0 %317 }
  0xaf   : >> { %v320_v58 = vmul.f32 %v318_v50, %v3998_v4  ;;  %v321_v59 = vmul.f32 %v318_v50, %v3997_v5  ;;  %v348_v2 = vmul.f32 %v346_v48, %v3998_v4  ;;  %v349_v3 = vmul.f32 %v346_v48, %v3997_v5 }
  0xb0   : >> { %v322_v32 = vmul.f32 %v318_v50, %v3996_v6  ;;  %v323_v36 = vmul.f32 %v318_v50, %v3995_v7  ;;  %v350_v40 = vmul.f32 %v346_v48, %v3996_v6  ;;  %v351_v41 = vmul.f32 %v346_v48, %v3995_v7 }
  0xb1   : >> { %v387_v50 = vmul.f32 %v382_v49, %v3991_v11  ;;  %v389_v4 = vadd.f32 %v385_v46, %v377_v62 }
  0xb3   : >> { %v410_v48 = vpop.permute.xlu2 %409 }
  0xb7   : >> { %v354_v51 = vpop.permute.xlu1 %353  ;;  %v326_v53 = vpop.permute.xlu0 %325 }
  0xb8   : >> { %v356_v55 = vmul.f32 %v354_v51, %v3994_v8  ;;  %v357_v56 = vmul.f32 %v354_v51, %v3993_v9  ;;  %v328_v60 = vmul.f32 %v326_v53, %v3994_v8  ;;  %v329_v61 = vmul.f32 %v326_v53, %v3993_v9 }
  0xb9   : >> { %v358_v33 = vmul.f32 %v354_v51, %v3992_v10  ;;  %v359_v34 = vmul.f32 %v354_v51, %v3991_v11  ;;  %v330_v35 = vmul.f32 %v326_v53, %v3992_v10  ;;  %v331_v39 = vmul.f32 %v326_v53, %v3991_v11 }
  0xba   : >> { %v360_v37 = vadd.f32 %v356_v55, %v348_v2  ;;  %v361_v38 = vadd.f32 %v357_v56, %v349_v3  ;;  %v332_v42 = vadd.f32 %v328_v60, %v320_v58  ;;  %v333_v43 = vadd.f32 %v329_v61, %v321_v59 }
  0xbb   : >> { %v386_v51 = vmul.f32 %v382_v49, %v3992_v10  ;;  %v362_v55 = vadd.f32 %v358_v33, %v350_v40  ;;  %v363_v56 = vadd.f32 %v359_v34, %v351_v41  ;;  %v334_v2 = vadd.f32 %v330_v35, %v322_v32 }
  0xbc   : >> { %v2769_v53 = vadd.f32 %v366_v52, %v360_v37  ;;  %v2771_v3 = vadd.f32 %v366_v52, %v361_v38  ;;  %v335_v58 = vadd.f32 %v331_v39, %v323_v36  ;;  %v391_v33 = vadd.f32 %v387_v50, %v379_v44 }
  0xbd   : >> { %v390_v5 = vadd.f32 %v386_v51, %v378_v63  ;;  %v2777_v6 = vadd.f32 %v366_v52, %v362_v55  ;;  %v2779_v49 = vadd.f32 %v366_v52, %v363_v56 }
  0xbe   : >> { %v412_v34 = vmul.f32 %v410_v48, %v2769_v53  ;;  %v413_v35 = vmul.f32 %v410_v48, %v2771_v3  ;;  %vm436_vm4 = vcmp.ge.f32.partialorder %v2769_v53, 0.0  ;;  %vm437_vm6 = vcmp.ge.f32.partialorder %v2771_v3, 0.0 }
  0xbf   : >> { %vm438_vm7 = vcmp.ge.f32.partialorder %v2777_v6, 0.0  ;;  %vm439_vm9 = vcmp.ge.f32.partialorder %v2779_v49, 0.0 }
  0xc0   : >> { %v338_v57 = vpop.permute.xlu1 %337  ;;  %v394_v60 = vpop.permute.xlu0 %393 }
  0xc1   : >> { %v2773_v59 = vadd.f32 %v338_v57, %v332_v42  ;;  %v2775_v47 = vadd.f32 %v338_v57, %v333_v43  ;;  %v2781_v32 = vadd.f32 %v338_v57, %v334_v2  ;;  %v2785_v36 = vadd.f32 %v338_v57, %v335_v58 }
  0xc2   : >> { %v2787_v37 = vadd.f32 %v394_v60, %v388_v0  ;;  %v2789_v38 = vadd.f32 %v394_v60, %v389_v4  ;;  %v2791_v54 = vadd.f32 %v394_v60, %v390_v5  ;;  %v414_v57 = vmul.f32 %v410_v48, %v2777_v6 }
  0xc3   : >> { %vm432_vm1 = vcmp.ge.f32.partialorder %v2773_v59, 0.0  ;;  %vm433_vm2 = vcmp.ge.f32.partialorder %v2775_v47, 0.0  ;;  %v415_v0 = vmul.f32 %v410_v48, %v2779_v49  ;;  %vm434_vm3 = vcmp.ge.f32.partialorder %v2781_v32, 0.0 }
  0xc4   : >> { %v2803_v4 = vadd.f32 %v394_v60, %v391_v33  ;;  %vm435_vm5 = vcmp.ge.f32.partialorder %v2785_v36, 0.0  ;;  %vm2808_vm8 = vmand %vm432_vm1, %vm436_vm4  ;;  %vm444_vm11 = vcmp.ge.f32.partialorder %v2787_v37, 0.0  ;;  %vm445_vm12 = vcmp.ge.f32.partialorder %v2789_v38, 0.0  ;;  %v464_v60 = vpop.permute.xlu2 %463 }
  0xc5   : >> { %vm2815_vm10 = vmand %vm433_vm2, %vm437_vm6  ;;  %vm446_vm13 = vcmp.ge.f32.partialorder %v2791_v54, 0.0 }
  0xc6   : >> { %vm442_vm14 = vmand %vm434_vm3, %vm438_vm7  ;;  %vm447_vm0 = vcmp.ge.f32.partialorder %v2803_v4, 0.0 }
  0xc7   : >> { %vm443_vm15 = vmand %vm435_vm5, %vm439_vm9 }
  0xc8   : >> { %vm448_vm1 = vmand %vm2808_vm8, %vm444_vm11 }
  0xc9   : >> { %v402_v61 = vpop.permute.xlu1 %401  ;;  %vm449_vm2 = vmand %vm2815_vm10, %vm445_vm12  ;;  %vm465_vm10 = vcmp.eq.s32.totalorder %v464_v60, 1 }
  0xca   : >> { %v404_v52 = vmul.f32 %v402_v61, %v2773_v59  ;;  %v405_v62 = vmul.f32 %v402_v61, %v2775_v47  ;;  %v406_v63 = vmul.f32 %v402_v61, %v2781_v32  ;;  %v407_v39 = vmul.f32 %v402_v61, %v2785_v36  ;;  %vm450_vm3 = vmand %vm442_vm14, %vm446_vm13 }
  0xcb   : >> { %vm451_vm4 = vmand %vm443_vm15, %vm447_vm0 }
  0xcc   : >> { %v416_v42 = vadd.f32 %v412_v34, %v404_v52  ;;  %v417_v43 = vadd.f32 %v413_v35, %v405_v62  ;;  %v418_v44 = vadd.f32 %v414_v57, %v406_v63  ;;  %v419_v45 = vadd.f32 %v415_v0, %v407_v39 }
  0xd2   : >> { %v422_v41 = vpop.permute.xlu1 %421 }
  0xd3   : >> { %v424_v46 = vmul.f32 %v422_v41, %v2787_v37  ;;  %v425_v51 = vmul.f32 %v422_v41, %v2789_v38  ;;  %v426_v50 = vmul.f32 %v422_v41, %v2791_v54  ;;  %v427_v55 = vmul.f32 %v422_v41, %v2803_v4 }
  0xd4   : >> { %v498_v41 = vstv %s1915_s12  ;;  %s1331_s12 = sadd.s32 (%p3107_p0), 1, %s3404_s22 }
  0xd5   : >> { %v428_v56 = vadd.f32 %v424_v46, %v416_v42  ;;  %v429_v2 = vadd.f32 %v425_v51, %v417_v43  ;;  %v430_v48 = vadd.f32 %v426_v50, %v418_v44  ;;  %v431_v58 = vadd.f32 %v427_v55, %v419_v45  ;;  %s3452_s2 = sld [smem:[#allocation2 + %s1331_s12]] (%p3107_p0) }
  0xd6   : >> { %v499_v50 = vadd.s32 %v498_v41, %v4015_v1  ;;  %s3469_s12 = sld [smem:[#allocation2 + %s1396_s6]] (%p3107_p0) }
  0xd7   : >> { %vm452_vm5 = vcmp.ge.f32.partialorder %v428_v56, 0.0  ;;  %vm453_vm6 = vcmp.ge.f32.partialorder %v429_v2, 0.0  ;;  %vm454_vm7 = vcmp.ge.f32.partialorder %v430_v48, 0.0  ;;  %vm455_vm9 = vcmp.ge.f32.partialorder %v431_v58, 0.0 }
  0xd8   : >> { %vm456_vm8 = vmand %vm448_vm1, %vm452_vm5 }
  0xd9   : >> { %vm457_vm11 = vmand %vm449_vm2, %vm453_vm6 }
  0xda   : >> { %vm458_vm12 = vmand %vm450_vm3, %vm454_vm7 }
  0xdb   : >> { %vm459_vm13 = vmand %vm451_vm4, %vm455_vm9 }
  0xdc   : >> { %vm2843_vm14 = vmand %vm456_vm8, %vm465_vm10  ;;  %4090 = sst [smem:[#allocation35_spill]] (%p3107_p0), %s3469_s12 }
  0xdd   : >> { %vm2847_vm0 = vmand %vm457_vm11, %vm465_vm10  ;;  %v470_v34 = vsel %vm2843_vm14, %v428_v56, 1e+10  ;;  %s3504_s12 = sld [smem:[#allocation2 + %s1535_s20]] (%p3107_p0)  ;;  %s1583_s20 = sadd.s32 (%p3107_p0), 20, %s3404_s22 }
  0xde   : >> { %vm2853_vm15 = vmand %vm458_vm12, %vm465_vm10  ;;  %v471_v52 = vsel %vm2847_vm0, %v429_v2, 1e+10  ;;  %v474_v62 = vrot.slane %v470_v34, 4  ;;  %s3529_s13 = sld [smem:[#allocation2 + %s1583_s20]] (%p3107_p0) }
  0xdf   : >> { %vm2859_vm1 = vmand %vm459_vm13, %vm465_vm10  ;;  %v472_v39 = vsel %vm2853_vm15, %v430_v48, 1e+10  ;;  %v480_v57 = vrot.slane %v471_v52, 4  ;;  %s3581_s20 = sld [smem:[#allocation2 + %s1619_s21]] (%p3107_p0) }
  0xe0   : >> { %v473_v0 = vsel %vm2859_vm1, %v431_v58, 1e+10  ;;  %v475_v5 = vmin.f32 %v470_v34, %v474_v62  ;;  %v486_v40 = vrot.slane %v472_v39, 4  ;;  %v2870_v62 = vcvt.s32.f32 %v499_v50  ;;  %s4108_s23 = sld [smem:[#allocation35_spill]] (%p3107_p0) }
  0xe1   : >> { %v481_v42 = vmin.f32 %v471_v52, %v480_v57  ;;  %v492_v43 = vrot.slane %v473_v0, 4  ;;  %s4110_s21 = sld [smem:[#allocation36_spill]] (%p3107_p0) }
  0xe2   : >> { %v476_v44 = vrot.slane %v475_v5, 2  ;;  %v487_v45 = vmin.f32 %v472_v39, %v486_v40 }
  0xe3   : >> { %v482_v46 = vrot.slane %v481_v42, 2  ;;  %v493_v51 = vmin.f32 %v473_v0, %v492_v43 }
  0xe4   : >> { %v477_v55 = vmin.f32 %v475_v5, %v476_v44  ;;  %v488_v56 = vrot.slane %v487_v45, 2 }
  0xe5   : >> { %v483_v2 = vmin.f32 %v481_v42, %v482_v46  ;;  %v494_v48 = vrot.slane %v493_v51, 2  ;;  %v4087_v42 = vld [vmem:[#allocation16_spill] sm:$0xff] (%p3107_p0) }
  0xe6   : >> { %v478_v60 = vrot.slane %v477_v55, 1  ;;  %v489_v7 = vmin.f32 %v487_v45, %v488_v56  ;;  %v667_v45 = vadd.s32 (%p3107_p0), 24, %v4087_v42 }
  0xe7   : >> { %v484_v8 = vrot.slane %v483_v2, 1  ;;  %v495_v58 = vmin.f32 %v493_v51, %v494_v48  ;;  %s4118_s15 = smul.f32 (%p3107_p0), 0.42904276, %s4110_s21 }
  0xe8   : >> { %v2872_v9 = vmin.f32 %v477_v55, %v478_v60  ;;  %v490_v57 = vrot.slane %v489_v7, 1 }
  0xe9   : >> { %v2874_v10 = vmin.f32 %v483_v2, %v484_v8  ;;  %v496_v40 = vrot.slane %v495_v58, 1 }
  0xea   : >> { %4016 = vst [vmem:[#allocation29_spill] sm:$0xff] %v2872_v9  ;;  %v2876_v11 = vmin.f32 %v489_v7, %v490_v57  ;;  %vm501_vm2 = vcmp.eq.f32.partialorder %v470_v34, %v2872_v9  ;;  %vm2881_vm3 = vcmp.lt.f32.partialorder %v2872_v9, %v2486_v31  ;;  %v666_v7 = vadd.s32 (%p3107_p0), 16, %v4087_v42 }
  0xeb   : >> { %4017 = vst [vmem:[#allocation30_spill] sm:$0xff] %v2874_v10  ;;  %v2885_v41 = vmin.f32 %v495_v58, %v496_v40  ;;  %vm502_vm4 = vcmp.eq.f32.partialorder %v471_v52, %v2874_v10  ;;  %vm2890_vm5 = vmand %vm2843_vm14, %vm501_vm2  ;;  %vm2896_vm6 = vcmp.lt.f32.partialorder %v2874_v10, %v2482_v30 }
  0xec   : >> { %4018 = vst [vmem:[#allocation31_spill] sm:$0xff] %v2876_v11  ;;  %vm503_vm7 = vcmp.eq.f32.partialorder %v472_v39, %v2876_v11  ;;  %vm2907_vm9 = vmand %vm2847_vm0, %vm502_vm4  ;;  %v509_v52 = vsel %vm2890_vm5, %v2870_v62, 1e+09  ;;  %vm2916_vm8 = vcmp.lt.f32.partialorder %v2876_v11, %v2478_v29  ;;  %v670_v5 = vcvt.s32.f32 (%p3107_p0), %v666_v7  ;;  %v1937_v7 = vld [vmem:[%s2622_s8 + $0x18] sm:$0xf] (%p3107_p0) }
  0xed   : >> { %vm504_vm11 = vcmp.eq.f32.partialorder %v473_v0, %v2885_v41  ;;  %vm2927_vm10 = vmand %vm2853_vm15, %vm503_vm7  ;;  %v510_v43 = vsel %vm2907_vm9, %v2870_v62, 1e+09  ;;  %v513_v44 = vrot.slane %v509_v52, 4  ;;  %vm2936_vm12 = vcmp.lt.f32.partialorder %v2885_v41, %v2474_v28 }
  0xee   : >> { %vm2942_vm13 = vmand %vm2859_vm1, %vm504_vm11  ;;  %v511_v35 = vsel %vm2927_vm10, %v2870_v62, 1e+09  ;;  %v519_v46 = vrot.slane %v510_v43, 4 }
  0xef   : >> { %v512_v63 = vsel %vm2942_vm13, %v2870_v62, 1e+09  ;;  %v514_v55 = vmin.f32 %v509_v52, %v513_v44  ;;  %v525_v56 = vrot.slane %v511_v35, 4 }
  0xf0   : >> { %v520_v2 = vmin.f32 %v510_v43, %v519_v46  ;;  %v531_v48 = vrot.slane %v512_v63, 4 }
  0xf1   : >> { %v515_v60 = vrot.slane %v514_v55, 2  ;;  %v526_v58 = vmin.f32 %v511_v35, %v525_v56 }
  0xf2   : >> { %v521_v57 = vrot.slane %v520_v2, 2  ;;  %v532_v40 = vmin.f32 %v512_v63, %v531_v48 }
  0xf3   : >> { %v516_v34 = vmin.f32 %v514_v55, %v515_v60  ;;  %v527_v39 = vrot.slane %v526_v58, 2 }
  0xf4   : >> { %v522_v51 = vmin.f32 %v520_v2, %v521_v57  ;;  %v533_v1 = vrot.slane %v532_v40, 2 }
  0xf5   : >> { %v517_v31 = vrot.slane %v516_v34, 1  ;;  %v528_v9 = vmin.f32 %v526_v58, %v527_v39 }
  0xf6   : >> { %v523_v30 = vrot.slane %v522_v51, 1  ;;  %v534_v50 = vmin.f32 %v532_v40, %v533_v1 }
  0xf7   : >> { %v518_v10 = vmin.f32 %v516_v34, %v517_v31  ;;  %v529_v29 = vrot.slane %v528_v9, 1 }
  0xf8   : >> { %v524_v11 = vmin.f32 %v522_v51, %v523_v30  ;;  %v535_v28 = vrot.slane %v534_v50, 1 }
  0xf9   : >> { %v2960_v52 = vmin.f32 %v528_v9, %v529_v29  ;;  %vm537_vm14 = vcmp.eq.f32.partialorder %v2870_v62, %v518_v10  ;;  %v2966_v27 = vsel %vm2881_vm3, %v518_v10, %v2470_v27  }
  0xfa   : >> { %v4035_v43 = vmov %v2966_v27  ;;  %v2968_v44 = vmin.f32 %v534_v50, %v535_v28  ;;  %vm538_vm0 = vcmp.eq.f32.partialorder %v2870_v62, %v524_v11  ;;  %vm541_vm15 = vmand %vm2890_vm5, %vm537_vm14  ;;  %v2976_v26 = vsel %vm2896_vm6, %v524_v11, %v2466_v26  }
  0xfb   : >> { %v4036_v1 = vmov %v2976_v26  ;;  %vm539_vm1 = vcmp.eq.f32.partialorder %v2870_v62, %v2960_v52  ;;  %vm2982_vm2 = vmand %vm2907_vm9, %vm538_vm0  ;;  %v545_v10 = vsel %vm541_vm15, %v2773_v59, 0.0  ;;  %v573_v27 = vsel %vm541_vm15, %v2769_v53, 0.0 }
  0xfc   : >> { %v2989_v28 = vsel %vm541_vm15, %v2787_v37, 0.0  ;;  %vm540_vm4 = vcmp.eq.f32.partialorder %v2870_v62, %v2968_v44  ;;  %vm2995_vm5 = vmand %vm2927_vm10, %vm539_vm1  ;;  %v546_v26 = vsel %vm2982_vm2, %v2775_v47, 0.0  ;;  %v549_v29 = vrot.slane %v545_v10, 4 }
  0xfd   : >> { %v574_v30 = vsel %vm2982_vm2, %v2771_v3, 0.0  ;;  %vm3007_vm7 = vmand %vm2942_vm13, %vm540_vm4  ;;  %v547_v53 = vsel %vm2995_vm5, %v2781_v32, 0.0  ;;  %v555_v59 = vrot.slane %v546_v26, 4  ;;  %v575_v47 = vsel %vm2995_vm5, %v2777_v6, 0.0 }
  0xfe   : >> { %v577_v37 = vrot.slane %v573_v27, 4  ;;  %v548_v3 = vsel %vm3007_vm7, %v2785_v36, 0.0  ;;  %v550_v62 = vadd.f32 %v549_v29, %v545_v10  ;;  %v561_v8 = vrot.slane %v547_v53, 4 }
  0xff   : >> { %v576_v34 = vsel %vm3007_vm7, %v2779_v49, 0.0  ;;  %v556_v61 = vadd.f32 %v555_v59, %v546_v26  ;;  %v567_v39 = vrot.slane %v548_v3, 4  ;;  %v583_v32 = vrot.slane %v574_v30, 4 }
 0x100   : >> { %v578_v33 = vadd.f32 %v577_v37, %v573_v27  ;;  %v551_v0 = vrot.slane %v550_v62, 2  ;;  %v562_v35 = vadd.f32 %v561_v8, %v547_v53  ;;  %v589_v46 = vrot.slane %v575_v47, 4 }
 0x101   : >> { %v595_v51 = vrot.slane %v576_v34, 4  ;;  %v557_v6 = vrot.slane %v556_v61, 2  ;;  %v568_v50 = vadd.f32 %v567_v39, %v548_v3  ;;  %v584_v55 = vadd.f32 %v583_v32, %v574_v30 }
 0x102   : >> { %v579_v63 = vrot.slane %v578_v33, 2  ;;  %v552_v56 = vadd.f32 %v551_v0, %v550_v62  ;;  %v563_v36 = vrot.slane %v562_v35, 2  ;;  %v590_v2 = vadd.f32 %v589_v46, %v575_v47 }
 0x103   : >> { %v596_v48 = vadd.f32 %v595_v51, %v576_v34  ;;  %v558_v60 = vadd.f32 %v557_v6, %v556_v61  ;;  %v569_v58 = vrot.slane %v568_v50, 2  ;;  %v585_v49 = vrot.slane %v584_v55, 2 }
 0x104   : >> { %v580_v57 = vadd.f32 %v579_v63, %v578_v33  ;;  %v553_v40 = vrot.slane %v552_v56, 1  ;;  %v564_v10 = vadd.f32 %v563_v36, %v562_v35  ;;  %v591_v27 = vrot.slane %v590_v2, 2 }
 0x105   : >> { %v597_v26 = vrot.slane %v596_v48, 2  ;;  %v559_v29 = vrot.slane %v558_v60, 1  ;;  %v570_v53 = vadd.f32 %v569_v58, %v568_v50  ;;  %v586_v37 = vadd.f32 %v585_v49, %v584_v55 }
 0x106   : >> { %v581_v59 = vrot.slane %v580_v57, 1  ;;  %v554_v8 = vadd.f32 %v553_v40, %v552_v56  ;;  %v565_v3 = vrot.slane %v564_v10, 1  ;;  %v592_v39 = vadd.f32 %v591_v27, %v590_v2 }
 0x107   : >> { %v598_v30 = vadd.f32 %v597_v26, %v596_v48  ;;  %v560_v62 = vadd.f32 %v559_v29, %v558_v60  ;;  %v571_v32 = vrot.slane %v570_v53, 1  ;;  %v587_v34 = vrot.slane %v586_v37, 1 }
 0x108   : >> { %v582_v47 = vadd.f32 %v581_v59, %v580_v57  ;;  %v566_v61 = vadd.f32 %v565_v3, %v564_v10  ;;  %v593_v0 = vrot.slane %v592_v39, 1  ;;  %v602_v35 = vsel %vm2982_vm2, %v2789_v38, 0.0 }
 0x109   : >> { %v599_v33 = vrot.slane %v598_v30, 1  ;;  %v572_v46 = vadd.f32 %v571_v32, %v570_v53  ;;  %v588_v51 = vadd.f32 %v587_v34, %v586_v37  ;;  %v603_v6 = vsel %vm2995_vm5, %v2791_v54, 0.0 }
 0x10a   : >> { %v604_v50 = vsel %vm3007_vm7, %v2803_v4, 0.0  ;;  %v594_v63 = vadd.f32 %v593_v0, %v592_v39  ;;  %v605_v56 = vrot.slane %v2989_v28, 4  ;;  %v611_v36 = vrot.slane %v602_v35, 4 }
 0x10b   : >> { %v600_v55 = vadd.f32 %v599_v33, %v598_v30  ;;  %v617_v2 = vrot.slane %v603_v6, 4  ;;  %v623_v48 = vrot.slane %v604_v50, 4  ;;  %v3037_v25 = vsel %vm2916_vm8, %v2960_v52, %v2462_v25   ;;  %v4079_v30 = vld [vmem:[#allocation26_spill] sm:$0xff] }
 0x10c   : >> { %4043 = vst [vmem:[#allocation32_spill] sm:$0xff] %v3037_v25  ;;  %v4044_v38 = vmov %v3037_v25  ;;  %v3043_v24 = vsel %vm2936_vm12, %v2968_v44, %v2458_v24   ;;  %v606_v4 = vadd.f32 %v605_v56, %v2989_v28  ;;  %v612_v9 = vadd.f32 %v611_v36, %v602_v35 }
 0x10d   : >> { %4045 = vst [vmem:[#allocation33_spill] sm:$0xff] %v3043_v24  ;;  %v4046_v54 = vmov %v3043_v24  ;;  %v3049_v23 = vsel %vm2881_vm3, %v554_v8, %v2454_v23   ;;  %v3054_v22 = vsel %vm2896_vm6, %v560_v62, %v2450_v22   ;;  %v618_v25 = vadd.f32 %v617_v2, %v603_v6 }
 0x10e   : >> { %v4047_v11 = vmov %v3049_v23  ;;  %v4048_v52 = vmov %v3054_v22  ;;  %v624_v31 = vadd.f32 %v623_v48, %v604_v50  ;;  %v3059_v21 = vsel %vm2916_vm8, %v566_v61, %v2446_v21  }
 0x10f   : >> { %v4049_v44 = vmov %v3059_v21  ;;  %v3064_v20 = vsel %vm2936_vm12, %v572_v46, %v2442_v20   ;;  %v607_v24 = vrot.slane %v606_v4, 2  ;;  %v613_v28 = vrot.slane %v612_v9, 2 }
 0x110   : >> { %v4050_v60 = vmov %v3064_v20  ;;  %v3069_v19 = vsel %vm2881_vm3, %v582_v47, %v2438_v19   ;;  %v3074_v18 = vsel %vm2896_vm6, %v588_v51, %v2434_v18   ;;  %v619_v22 = vrot.slane %v618_v25, 2  ;;  %v4082_v47 = vld [vmem:[#allocation27_spill] sm:$0xff] }
 0x111   : >> { %v4051_v58 = vmov %v3069_v19  ;;  %v4052_v57 = vmov %v3074_v18  ;;  %v625_v23 = vrot.slane %v624_v31, 2  ;;  %v3079_v17 = vsel %vm2916_vm8, %v594_v63, %v2430_v17  }
 0x112   : >> { %v4053_v49 = vmov %v3079_v17  ;;  %v3084_v16 = vsel %vm2936_vm12, %v600_v55, %v2426_v16   ;;  %v608_v20 = vadd.f32 %v607_v24, %v606_v4  ;;  %v614_v21 = vadd.f32 %v613_v28, %v612_v9  ;;  %v4076_v28 = vld [vmem:[#allocation25_spill] sm:$0xff] }
 0x113   : >> { %v4054_v40 = vmov %v3084_v16  ;;  %v620_v19 = vadd.f32 %v619_v22, %v618_v25  ;;  %v626_v10 = vadd.f32 %v625_v23, %v624_v31  ;;  %v4065_v17 = vmov %v4053_v49  ;;  %v4084_v31 = vld [vmem:[#allocation29_spill] sm:$0xff] }
 0x114   : >> { %v609_v27 = vrot.slane %v608_v20, 1  ;;  %v615_v26 = vrot.slane %v614_v21, 1  ;;  %v4064_v16 = vmov %v4054_v40  ;;  %v4070_v22 = vmov %v4048_v52 }
 0x115   : >> { %v621_v29 = vrot.slane %v620_v19, 1  ;;  %v627_v18 = vrot.slane %v626_v10, 1  ;;  %v4071_v23 = vmov %v4047_v11  ;;  %v4072_v24 = vmov %v4046_v54 }
 0x116   : >> { %v610_v53 = vadd.f32 %v609_v27, %v608_v20  ;;  %v616_v59 = vadd.f32 %v615_v26, %v614_v21  ;;  %v4068_v20 = vmov %v4050_v60  ;;  %v4069_v21 = vmov %v4049_v44 }
 0x117   : >> { %v622_v37 = vadd.f32 %v621_v29, %v620_v19  ;;  %v628_v8 = vadd.f32 %v627_v18, %v626_v10  ;;  %v4066_v18 = vmov %v4052_v57  ;;  %v4067_v19 = vmov %v4051_v58  ;;  %v4078_v29 = vld [vmem:[#allocation31_spill] sm:$0xff] }
 0x118   : >> { %v3089_v15 = vsel %vm2881_vm3, %v610_v53, %v2422_v15   ;;  %v3094_v14 = vsel %vm2896_vm6, %v616_v59, %v2418_v14   ;;  %v4073_v25 = vmov %v4044_v38  ;;  %v4074_v26 = vmov %v4036_v1  ;;  %v1936_v18 = vld [vmem:[%s2622_s8 + $0x10] sm:$0xff] (%p3107_p0) }
 0x119   : >> { %v4055_v3 = vmov %v3089_v15  ;;  %v4056_v39 = vmov %v3094_v14  ;;  %v3099_v13 = vsel %vm2916_vm8, %v622_v37, %v2414_v13   ;;  %v3104_v12 = vsel %vm2936_vm12, %v628_v8, %v2410_v12   ;;  %290 = sbr.rel (!%p3107_p0) target bundleno = 57 (0x39), region = 120 }
 0x11a   : >> { %v4057_v62 = vmov %v3099_v13  ;;  %v4058_v32 = vmov %v3104_v12  ;;  %v4062_v14 = vmov %v4056_v39  ;;  %v4063_v15 = vmov %v4055_v3 }
 0x11b   : >> { %v4060_v12 = vmov %v4058_v32  ;;  %v4061_v13 = vmov %v4057_v62  ;;  %v4075_v27 = vmov %v4035_v43  ;;  %v4077_v28 = vsel %vm2936_vm12, %v2885_v41, %v4076_v28   ;;  %v4085_v41 = vld [vmem:[#allocation28_spill] sm:$0xff] }
 0x11c   : >> { %v4080_v29 = vsel %vm2916_vm8, %v4078_v29, %v4079_v30   ;;  %v4081_v30 = vld [vmem:[#allocation30_spill] sm:$0xff]  ;;  %v4086_v31 = vsel %vm2881_vm3, %v4084_v31, %v4085_v41   ;;  %v3194_v34 = vcvt.s32.f32 (%p3107_p0), %v4087_v42  ;;  %v671_v61 = vcvt.s32.f32 (%p3107_p0), %v667_v45 }
 0x11d   : >> { %v4083_v30 = vsel %vm2896_vm6, %v4081_v30, %v4082_v47   ;;  %v665_v0 = vadd.s32 (%p3107_p0), 8, %v4087_v42  ;;  %v3954_v12 = vmov (%p3107_p0), 0.0   ;;  %vm680_vm14 = vcmp.eq.f32.partialorder (%p3107_p0), %v670_v5, %v4035_v43 }
 0x11e   : > { %vm672_vm3 = vcmp.eq.f32.partialorder %v3194_v34, %v4035_v43  ;;  %vm684_vm6 = vcmp.eq.f32.partialorder %v671_v61, %v4035_v43  ;;  %vm685_vm9 = vcmp.eq.f32.partialorder %v671_v61, %v4036_v1  ;;  %vm686_vm8 = vcmp.eq.f32.partialorder %v671_v61, %v4044_v38 }
 0x11f   : > { %vm687_vm11 = vcmp.eq.f32.partialorder %v671_v61, %v4046_v54  ;;  %v3204_v13 = vsel %vm684_vm6, 1.0, %v3954_v12  ;;  %v3207_v14 = vsel %vm685_vm9, 1.0, %v3954_v12  ;;  %v3210_v15 = vsel %vm686_vm8, 1.0, %v3954_v12 }
 0x120   : > { %v3213_v16 = vsel %vm687_vm11, 1.0, %v3954_v12  ;;  %v753_v17 = vmul.f32 %v3204_v13, %v4051_v58  ;;  %v754_v33 = vmul.f32 %v3207_v14, %v4052_v57  ;;  %v669_v35 = vcvt.s32.f32 %v665_v0 }
 0x121   : > { %vm673_vm10 = vcmp.eq.f32.partialorder %v3194_v34, %v4036_v1  ;;  %v755_v46 = vmul.f32 %v3210_v15, %v4053_v49  ;;  %v756_v51 = vmul.f32 %v3213_v16, %v4054_v40  ;;  %vm674_vm12 = vcmp.eq.f32.partialorder %v3194_v34, %v4044_v38 }
 0x122   : > { %vm675_vm13 = vcmp.eq.f32.partialorder %v3194_v34, %v4046_v54  ;;  %776 = vmatpush.msra.mxu0 %v753_v17  ;;  %799 = vmatpush.msra.mxu1 %v754_v33  ;;  %vm681_vm0 = vcmp.eq.f32.partialorder %v670_v5, %v4036_v1  ;;  %vm682_vm15 = vcmp.eq.f32.partialorder %v670_v5, %v4044_v38  ;;  %v3236_v6 = vsel %vm672_vm3, 1.0, %v3954_v12 }
 0x123   : > { %822 = vmatpush.msra.mxu2 %v755_v46  ;;  %845 = vmatpush.msra.mxu3 %v756_v51  ;;  %v3239_v50 = vsel %vm680_vm14, 1.0, %v3954_v12  ;;  %v3242_v63 = vsel %vm681_vm0, 1.0, %v3954_v12  ;;  %v3245_v55 = vsel %vm682_vm15, 1.0, %v3954_v12  ;;  %vm683_vm1 = vcmp.eq.f32.partialorder %v670_v5, %v4046_v54 }
 0x124   : > { %v749_v56 = vmul.f32 %v3239_v50, %v4051_v58  ;;  %v750_v36 = vmul.f32 %v3242_v63, %v4052_v57  ;;  %v751_v2 = vmul.f32 %v3245_v55, %v4053_v49  ;;  %v3255_v48 = vsel %vm683_vm1, 1.0, %v3954_v12 }
 0x125   : > { %v752_v4 = vmul.f32 %v3255_v48, %v4054_v40  ;;  %vm676_vm2 = vcmp.eq.f32.partialorder %v669_v35, %v4035_v43  ;;  %vm677_vm4 = vcmp.eq.f32.partialorder %v669_v35, %v4036_v1  ;;  %vm678_vm5 = vcmp.eq.f32.partialorder %v669_v35, %v4044_v38 }
 0x126   : > { %777 = vmatpush.msra.mxu0 %v749_v56  ;;  %800 = vmatpush.msra.mxu1 %v750_v36  ;;  %v3263_v9 = vsel %vm676_vm2, 1.0, %v3954_v12  ;;  %v3266_v25 = vsel %vm677_vm4, 1.0, %v3954_v12  ;;  %v3269_v31 = vsel %vm678_vm5, 1.0, %v3954_v12  ;;  %vm679_vm7 = vcmp.eq.f32.partialorder %v669_v35, %v4046_v54 }
 0x127   : > { %823 = vmatpush.msra.mxu2 %v751_v2  ;;  %846 = vmatpush.msra.mxu3 %v752_v4  ;;  %v745_v24 = vmul.f32 %v3263_v9, %v4051_v58  ;;  %v746_v28 = vmul.f32 %v3266_v25, %v4052_v57  ;;  %v747_v22 = vmul.f32 %v3269_v31, %v4053_v49  ;;  %v3279_v23 = vsel %vm679_vm7, 1.0, %v3954_v12 }
 0x128   : > { %v748_v20 = vmul.f32 %v3279_v23, %v4054_v40  ;;  %v741_v21 = vmul.f32 %v3236_v6, %v4051_v58  ;;  %v3289_v19 = vsel %vm673_vm10, 1.0, %v3954_v12  ;;  %v3295_v10 = vsel %vm674_vm12, 1.0, %v3954_v12 }
 0x129   : > { %778 = vmatpush.msra.mxu0 %v745_v24  ;;  %801 = vmatpush.msra.mxu1 %v746_v28  ;;  %v742_v27 = vmul.f32 %v3289_v19, %v4052_v57  ;;  %v743_v58 = vmul.f32 %v3295_v10, %v4053_v49  ;;  %v3305_v26 = vsel %vm675_vm13, 1.0, %v3954_v12  ;;  %vm757_vm3 = vcmask 261120  }
 0x12a   : > { %824 = vmatpush.msra.mxu2 %v747_v22  ;;  %847 = vmatpush.msra.mxu3 %v748_v20  ;;  %v744_v29 = vmul.f32 %v3305_v26, %v4054_v40  ;;  %v736_v57 = vmul.f32 %v3210_v15, %v4049_v44  ;;  %v737_v49 = vmul.f32 %v3213_v16, %v4050_v60  ;;  %vm653_vm6 = vcmp.ge.f32.partialorder %v4035_v43, 0.0 }
 0x12b   : > { %779 = vmatpush.msra.mxu0 %v741_v21  ;;  %802 = vmatpush.msra.mxu1 %v742_v27  ;;  %v734_v53 = vmul.f32 %v3204_v13, %v4047_v11  ;;  %v735_v59 = vmul.f32 %v3207_v14, %v4048_v52  ;;  %v732_v40 = vmul.f32 %v3245_v55, %v4049_v44  ;;  %vm654_vm9 = vcmp.ge.f32.partialorder %v4036_v1, 0.0 }
 0x12c   : > { %825 = vmatpush.msra.mxu2 %v743_v58  ;;  %848 = vmatpush.msra.mxu3 %v744_v29  ;;  %v733_v37 = vmul.f32 %v3255_v48, %v4050_v60  ;;  %v730_v8 = vmul.f32 %v3239_v50, %v4047_v11  ;;  %v731_v30 = vmul.f32 %v3242_v63, %v4048_v52  ;;  %vm1094_vm10 = vcmask 1040384  }
 0x12d   : > { %1938 = vmatmul.msk.f32.vlgmr.msra.gmra.mxu0 %vm757_vm3, %v1936_v18  ;;  %1940 = vmatmul.msk.f32.vlgmr.msra.gmra.mxu1 %vm757_vm3, %v1936_v18  ;;  %v728_v47 = vmul.f32 %v3269_v31, %v4049_v44  ;;  %v729_v41 = vmul.f32 %v3279_v23, %v4050_v60  ;;  %v726_v42 = vmul.f32 %v3263_v9, %v4047_v11  ;;  %vm1096_vm12 = vcmask 1042434  }
 0x12e   : > { %1942 = vmatmul.msk.f32.vlgmr.msra.gmra.mxu2 %vm757_vm3, %v1936_v18  ;;  %1944 = vmatmul.msk.f32.vlgmr.msra.gmra.mxu3 %vm757_vm3, %v1936_v18  ;;  %v727_v45 = vmul.f32 %v3266_v25, %v4048_v52  ;;  %v724_v34 = vmul.f32 %v3295_v10, %v4049_v44  ;;  %v725_v61 = vmul.f32 %v3305_v26, %v4050_v60  ;;  %vm1098_vm13 = vcmask 1041408  }
 0x12f   : > { %920 = vmatpush.msrb.mxu2 %v736_v57  ;;  %943 = vmatpush.msrb.mxu3 %v737_v49  ;;  %v722_v0 = vmul.f32 %v3236_v6, %v4047_v11  ;;  %v723_v5 = vmul.f32 %v3289_v19, %v4048_v52  ;;  %v971_v17 = vmul.f32 %v3210_v15, %v4057_v62  ;;  %v720_v15 = vld [vmem:[%s2622_s8] sm:$0xff]  ;;  %v3527_v57 = vstv %s4096_s5  ;;  %s4101_s5 = smul.f32 0.2820948, %s3452_s2 }
 0x130   : > { %874 = vmatpush.msrb.mxu0 %v734_v53  ;;  %897 = vmatpush.msrb.mxu1 %v735_v59  ;;  %v972_v33 = vmul.f32 %v3213_v16, %v4058_v32  ;;  %v969_v44 = vmul.f32 %v3204_v13, %v4055_v3  ;;  %v970_v11 = vmul.f32 %v3207_v14, %v4056_v39  ;;  %v3536_v49 = vstv %s4097_s18  ;;  %s1537_s2 = smul.f32 1.0233268, %s3504_s12 }
 0x131   : > { %921 = vmatpush.msrb.mxu2 %v732_v40  ;;  %944 = vmatpush.msrb.mxu3 %v733_v37  ;;  %v967_v52 = vmul.f32 %v3245_v55, %v4057_v62  ;;  %v968_v60 = vmul.f32 %v3255_v48, %v4058_v32  ;;  %v965_v13 = vmul.f32 %v3239_v50, %v4055_v3  ;;  %v3540_v53 = vstv %s4098_s0  ;;  %s4105_s0 = smul.f32 0.8580855, %s3429_s14 }
 0x132   : > { %875 = vmatpush.msrb.mxu0 %v730_v8  ;;  %898 = vmatpush.msrb.mxu1 %v731_v30  ;;  %v966_v14 = vmul.f32 %v3242_v63, %v4056_v39  ;;  %v963_v16 = vmul.f32 %v3269_v31, %v4057_v62  ;;  %v964_v35 = vmul.f32 %v3279_v23, %v4058_v32  ;;  %v3544_v59 = vstv %s4099_s10  ;;  %s4104_s10 = sld [smem:[#allocation34_spill]]  ;;  %s4116_s12 = smul.f32 0.8580855, %s3476_s3 }
 0x133   : > { %922 = vmatpush.msrb.mxu2 %v728_v47  ;;  %945 = vmatpush.msrb.mxu3 %v729_v41  ;;  %v961_v46 = vmul.f32 %v3263_v9, %v4055_v3  ;;  %v962_v51 = vmul.f32 %v3266_v25, %v4056_v39  ;;  %v959_v50 = vmul.f32 %v3295_v10, %v4057_v62  ;;  %v721_v62 = vld [vmem:[%s2622_s8 + $0x8] sm:$0xf]  ;;  %v3557_v37 = vstv %s4101_s5  ;;  %s1585_s18 = smul.f32 0.8580855, %s3529_s13  ;;  %s4133_s13 = sld [smem:[#allocation7_spill]] (%p2579_p5) }
 0x134   : > { %876 = vmatpush.msrb.mxu0 %v726_v42  ;;  %899 = vmatpush.msrb.mxu1 %v727_v45  ;;  %v960_v63 = vmul.f32 %v3305_v26, %v4058_v32  ;;  %v957_v55 = vmul.f32 %v3236_v6, %v4055_v3  ;;  %v958_v56 = vmul.f32 %v3289_v19, %v4056_v39  ;;  %v1954_v3 = vld [vmem:[%s2622_s8 + $0x20] sm:$0xff]  ;;  %v1955_v39 = vld [vmem:[%s2622_s8 + $0x28] sm:$0xf]  ;;  %s1257_s8 = sadd.s32 18, %s3404_s22  ;;  %v3561_v8 = vstv %s4102_s17 }
 0x135   : > { %1939 = vmatmul.msk.f32.gmra.mxu0 %vm757_vm3, %v1937_v7  ;;  %1941 = vmatmul.msk.f32.gmra.mxu1 %vm757_vm3, %v1937_v7  ;;  %s3431_s25 = sld [smem:[#allocation2 + %s1257_s8]]  ;;  %v3566_v30 = vstv %s4103_s24  ;;  %v3570_v47 = vstv %s4105_s0 }
 0x136   : > { %1943 = vmatmul.msk.f32.gmra.mxu2 %vm757_vm3, %v1937_v7  ;;  %1945 = vmatmul.msk.f32.gmra.mxu3 %vm757_vm3, %v1937_v7  ;;  %s3447_s8 = sld [smem:[#allocation2 + %s1281_s26]]  ;;  %s1420_s26 = sadd.s32 19, %s3404_s22 }
 0x137   : > { %923 = vmatpush.msrb.mxu2 %v724_v34  ;;  %946 = vmatpush.msrb.mxu3 %v725_v61  ;;  %s3481_s6 = sld [smem:[#allocation2 + %s1420_s26]]  ;;  %s1511_s26 = sadd.s32 8, %s3404_s22  ;;  %v3589_v61 = vstv %s1501_s4 }
 0x138   : > { %877 = vmatpush.msrb.mxu0 %v722_v0  ;;  %900 = vmatpush.msrb.mxu1 %v723_v5  ;;  %s3500_s27 = sld [smem:[#allocation2 + %s1511_s26]]  ;;  %s1607_s26 = sadd.s32 23, %s3404_s22 }
 0x139   : > { %1037 = vmatpush.msra.mxu2 %v971_v17  ;;  %1060 = vmatpush.msra.mxu3 %v972_v33  ;;  %s3547_s28 = sld [smem:[#allocation2 + %s1607_s26]]  ;;  %s4100_s22 = smul.f32 0.2820948, %s3414_s29 }
 0x13a   : > { %991 = vmatpush.msra.mxu0 %v969_v44  ;;  %1014 = vmatpush.msra.mxu1 %v970_v11  ;;  %s4107_s29 = smul.f32 1.0233268, %s3462_s1  ;;  %v3598_v11 = vstv %s1496_s19  ;;  %s4134_s19 = sld [smem:[#allocation15_spill]] (%p2579_p5) }
 0x13b   : > { %1038 = vmatpush.msra.mxu2 %v967_v52  ;;  %1061 = vmatpush.msra.mxu3 %v968_v60  ;;  %v3553_v40 = vstv %s4100_s22  ;;  %s4106_s7 = smul.f32 0.8580855, %s3431_s25  ;;  %s4112_s25 = sld [smem:[#allocation37_spill]] }
 0x13c   : > { %992 = vmatpush.msra.mxu0 %v965_v13  ;;  %1015 = vmatpush.msra.mxu1 %v966_v14  ;;  %v3578_v42 = vstv %s4107_s29  ;;  %s4111_s14 = smul.f32 0.24770796, %s4104_s10  ;;  %s4135_s24 = sld [smem:[#allocation42_spill]] (%p2579_p5) }
 0x13d   : > { %1946 = vmatmul.msk.f32.vlgmr.msrb.gmra.mxu0 %vm757_vm3, %v720_v15  ;;  %1948 = vmatmul.msk.f32.vlgmr.msrb.gmra.mxu1 %vm757_vm3, %v720_v15  ;;  %v3574_v41 = vstv %s4106_s7  ;;  %s4115_s1 = smul.f32 0.8580855, %s4108_s23 }
 0x13e   : > { %1950 = vmatmul.msk.f32.vlgmr.msrb.gmra.mxu2 %vm757_vm3, %v720_v15  ;;  %1952 = vmatmul.msk.f32.vlgmr.msrb.gmra.mxu3 %vm757_vm3, %v720_v15  ;;  %s1513_s30 = smul.f32 1.0233268, %s3500_s27  ;;  %v3596_v44 = vstv %s4111_s14 }
 0x13f   : > { %1039 = vmatpush.msra.mxu2 %v963_v16  ;;  %1062 = vmatpush.msra.mxu3 %v964_v35  ;;  %s4109_s27 = smul.f32 0.42904276, %s3447_s8  ;;  %v3607_v14 = vstv %s4115_s1 }
 0x140   : > { %993 = vmatpush.msra.mxu0 %v961_v46  ;;  %1016 = vmatpush.msra.mxu1 %v962_v51  ;;  %s1573_s8 = smul.f32 0.8580855, %s3515_s16  ;;  %v3609_v15 = vstv %s1513_s30  ;;  %v3613_v46 = vstv %s4116_s12 }
 0x141   : > { %1040 = vmatpush.msra.mxu2 %v959_v50  ;;  %1063 = vmatpush.msra.mxu3 %v960_v63  ;;  %v3587_v34 = vstv %s4109_s27  ;;  %s4117_s4 = smul.f32 0.8580855, %s3481_s6  ;;  %v3625_v63 = vstv %s4118_s15 }
 0x142   : > { %994 = vmatpush.msra.mxu0 %v957_v55  ;;  %1017 = vmatpush.msra.mxu1 %v958_v56  ;;  %s4119_s16 = smul.f32 0.24770796, %s4112_s25  ;;  %v3631_v56 = vstv %s1537_s2 }
 0x143   : > { %v3617_v51 = vstv %s4117_s4  ;;  %s1609_s3 = smul.f32 0.42904276, %s3547_s28 }
 0x144   : > { %v3629_v55 = vstv %s4119_s16  ;;  %s1621_s6 = smul.f32 0.24770796, %s3581_s20 }
 0x145   : > { %1947 = vmatmul.msk.f32.gmra.mxu0 %vm757_vm3, %v721_v62  ;;  %1949 = vmatmul.msk.f32.gmra.mxu1 %vm757_vm3, %v721_v62  ;;  %s1985_s28 = smul.u32 (%p2579_p5), 24, %s4133_s13 }
 0x146   : > { %1951 = vmatmul.msk.f32.gmra.mxu2 %vm757_vm3, %v721_v62  ;;  %1953 = vmatmul.msk.f32.gmra.mxu3 %vm757_vm3, %v721_v62 }
 0x147   : > { %s1692_s22 = sadd.s32 (%p2579_p5), %s1985_s28, %s4134_s19 }
 0x148   : > { %s1979_s5 = sshll.u32 (%p2579_p5), %s1692_s22, 3 }
 0x149   : > { %s1694_s10 = scalar_lea.vmem (%p2579_p5), %s4135_s24, %s1979_s5 }
 0x14d   : > { %1956 = vmatmul.msk.f32.vlgmr.msra.gmra.mxu0 %vm757_vm3, %v1954_v3  ;;  %1958 = vmatmul.msk.f32.vlgmr.msra.gmra.mxu1 %vm757_vm3, %v1954_v3 }
 0x14e   : > { %1960 = vmatmul.msk.f32.vlgmr.msra.gmra.mxu2 %vm757_vm3, %v1954_v3  ;;  %1962 = vmatmul.msk.f32.vlgmr.msra.gmra.mxu3 %vm757_vm3, %v1954_v3 }
 0x155   : > { %1957 = vmatmul.msk.f32.gmra.mxu0 %vm757_vm3, %v1955_v39  ;;  %1959 = vmatmul.msk.f32.gmra.mxu1 %vm757_vm3, %v1955_v39 }
 0x156   : > { %1961 = vmatmul.msk.f32.gmra.mxu2 %vm757_vm3, %v1955_v39  ;;  %1963 = vmatmul.msk.f32.gmra.mxu3 %vm757_vm3, %v1955_v39  ;;  %v3636_v39 = vstv %s1561_s11 }
 0x1aa   : > { %v3416_v32 = vpop.f32.mrf.mxu0  ;;  %v3418_v6 = vpop.f32.mrf.mxu1 }
 0x1b1   : > { %v3436_v36 = vpop.f32.mrf.mxu2  ;;  %v3438_v2 = vpop.f32.mrf.mxu3 }
 0x1b2   : > { %v3442_v48 = vpop.f32.mrf.mxu0  ;;  %v3444_v4 = vpop.f32.mrf.mxu1 }
 0x1b9   : > { %v3465_v9 = vpop.f32.mrf.mxu2  ;;  %v3467_v25 = vpop.f32.mrf.mxu3 }
 0x1ba   : > { %4089 = vst [vmem:[#allocation25_spill] sm:$0xff] %v3467_v25  ;;  %v879_v31 = vpop.f32.mrf.mxu0  ;;  %v902_v24 = vpop.f32.mrf.mxu1 }
 0x1bb   : > { %v880_v21 = vadd.f32 %v879_v31, %v3416_v32  ;;  %v903_v19 = vadd.f32 %v902_v24, %v3418_v6  ;;  %v3638_v32 = vstv %s1573_s8 }
 0x1c1   : > { %v925_v28 = vpop.f32.mrf.mxu2  ;;  %v948_v22 = vpop.f32.mrf.mxu3 }
 0x1c2   : > { %v882_v23 = vpop.f32.mrf.mxu0  ;;  %v905_v20 = vpop.f32.mrf.mxu1  ;;  %v926_v45 = vadd.f32 %v925_v28, %v3436_v36  ;;  %v949_v7 = vadd.f32 %v948_v22, %v3438_v2 }
 0x1c3   : > { %v883_v0 = vadd.f32 %v882_v23, %v3442_v48  ;;  %v906_v5 = vadd.f32 %v905_v20, %v3444_v4 }
 0x1c9   : > { %v3511_v10 = vpop.f32.mrf.mxu2  ;;  %v3513_v27 = vpop.f32.mrf.mxu3 }
 0x1ca   : > { %4093 = vst [vmem:[#allocation31_spill] sm:$0xff] %v3513_v27  ;;  %v996_v58 = vpop.f32.mrf.mxu0  ;;  %v1019_v26 = vpop.f32.mrf.mxu1 }
 0x1cb   : > { %v3520_v29 = vadd.f32 %v996_v58, %v880_v21  ;;  %v3522_v18 = vadd.f32 %v1019_v26, %v903_v19  ;;  %v3651_v26 = vstv %s1585_s18 }
 0x1cd   : > { %4094 = vst [vmem:[#allocation26_spill] sm:$0xff] %v3520_v29 }
 0x1ce   : > { %4095 = vst [vmem:[#allocation30_spill] sm:$0xff] %v3522_v18 }
 0x1cf   : > { %1079 = vst [vmem:[%s2634_s9] sm:$0xff] %v3520_v29 }
 0x1d0   : > { %1080 = vst [vmem:[%s2634_s9 + $0x8] sm:$0xff] %v3522_v18 }
 0x1d1   : > { %v1042_v17 = vpop.f32.mrf.mxu2  ;;  %v1065_v33 = vpop.f32.mrf.mxu3 }
 0x1d2   : > { %v3601_v52 = vadd.f32 %v1042_v17, %v926_v45  ;;  %v3603_v60 = vadd.f32 %v1065_v33, %v949_v7  ;;  %v999_v13 = vpop.f32.mrf.mxu0  ;;  %v1022_v16 = vpop.f32.mrf.mxu1  ;;  %v3653_v45 = vstv %s1609_s3 }
 0x1d3   : > { %v1075_v35 = vadd.f32 %v999_v13, %v883_v0  ;;  %v3619_v50 = vadd.f32 %v1022_v16, %v906_v5 }
 0x1d4   : > { %4113 = vst [vmem:[#allocation27_spill] sm:$0xff] %v3601_v52 }
 0x1d5   : > { %4114 = vst [vmem:[#allocation29_spill] sm:$0xff] %v3603_v60  ;;  %v1112_v62 = vrot.slane %v1075_v35, 1  ;;  %v1124_v3 = vrot.slane %v1075_v35, 2  ;;  %v1136_v6 = vmul.f32 %v1075_v35, %v1075_v35  ;;  %v1156_v36 = vmul.f32 3.0, %v1075_v35 }
 0x1d6   : > { %1081 = vst [vmem:[%s2634_s9 + $0x10] sm:$0xff] %v3601_v52  ;;  %v1177_v2 = vmul.f32 %v3527_v57, %v1075_v35  ;;  %v1189_v48 = vmul.f32 %v3536_v49, %v1075_v35  ;;  %v1213_v24 = vmul.f32 %v3540_v53, %v1075_v35  ;;  %v1340_v28 = vmul.f32 %v3544_v59, %v1075_v35 }
 0x1d7   : > { %1082 = vst [vmem:[%s2634_s9 + $0x18] sm:$0xff] %v3603_v60  ;;  %v1120_v4 = vmul.f32 %v1112_v62, %v1075_v35  ;;  %v1132_v31 = vmul.f32 %v1124_v3, %v1075_v35  ;;  %v1144_v22 = vrot.slane %v1136_v6, 1  ;;  %v1160_v23 = vmul.f32 %v1156_v36, %v1075_v35 }
 0x1d8   : > { %1083 = vst [vmem:[%s2634_s9 + $0x20] sm:$0xf] %v1075_v35  ;;  %v1181_v20 = vadd.f32 %v1177_v2, %v3553_v40  ;;  %v1197_v21 = vrot.slane %v1189_v48, 1  ;;  %v1221_v19 = vrot.slane %v1213_v24, 2  ;;  %v1344_v17 = vadd.f32 %v1340_v28, %v3557_v37 }
 0x1d9   : > { %1084 = vst [vmem:[%s2634_s9 + $0x28] sm:$0xf] %v3619_v50  ;;  %v1261_v58 = vmul.f32 %v3574_v41, %v1120_v4  ;;  %v1152_v7 = vsub.f32 %v1136_v6, %v1144_v22  ;;  %v1965_v0 = vadd.f32 -1.0, %v1160_v23  ;;  %v1352_v33 = vmul.f32 %v3561_v8, %v1075_v35 }
 0x1da   : > { %v1205_v5 = vadd.f32 %v1197_v21, %v1181_v20  ;;  %v1376_v13 = vmul.f32 %v3578_v42, %v1075_v35  ;;  %v1400_v16 = vmul.f32 %v3607_v14, %v1120_v4  ;;  %v3659_v62 = vstv %s1621_s6 }
 0x1db   : > { %v3663_v3 = vadd.f32 %v3511_v10, %v3465_v9  ;;  %v1237_v2 = vmul.f32 %v3566_v30, %v1120_v4  ;;  %v1412_v6 = vmul.f32 %v3613_v46, %v1132_v31  ;;  %v1249_v48 = vmul.f32 %v3570_v47, %v1132_v31 }
 0x1dc   : > { %v1229_v36 = vadd.f32 %v1221_v19, %v1205_v5  ;;  %v1360_v24 = vrot.slane %v1352_v33, 1  ;;  %v1424_v28 = vmul.f32 %v3617_v51, %v1120_v4  ;;  %v1448_v22 = vmul.f32 %v3625_v63, %v1152_v7 }
 0x1dd   : > { %v1269_v20 = vrot.slane %v1261_v58, 1  ;;  %v1460_v21 = vmul.f32 %v1965_v0, %v3629_v55  ;;  %v1503_v12 = vmul.f32 %v3589_v61, %v1075_v35  ;;  %v1384_v10 = vrot.slane %v1376_v13, 2 }
 0x1de   : > { %v1241_v23 = vadd.f32 %v1237_v2, %v1229_v36  ;;  %v1368_v9 = vadd.f32 %v1360_v24, %v1344_v17  ;;  %v1515_v19 = vmul.f32 %v3609_v15, %v1075_v35  ;;  %v1539_v5 = vmul.f32 %v3631_v56, %v1075_v35 }
 0x1df   : > { %v1297_v52 = vmul.f32 %v1965_v0, %v3596_v44  ;;  %v1507_v33 = vadd.f32 %v1503_v12, %v3598_v11  ;;  %v1563_v18 = vmul.f32 %v3636_v39, %v1120_v4  ;;  %v1285_v36 = vmul.f32 %v3587_v34, %v1152_v7 }
 0x1e0   : > { %v1253_v60 = vadd.f32 %v1249_v48, %v1241_v23  ;;  %v1392_v58 = vadd.f32 %v1384_v10, %v1368_v9  ;;  %v1523_v2 = vrot.slane %v1515_v19, 1  ;;  %v1575_v29 = vmul.f32 %v3638_v32, %v1132_v31 }
 0x1e1   : > { %v1587_v17 = vmul.f32 %v3651_v26, %v1120_v4  ;;  %v1611_v13 = vmul.f32 %v3653_v45, %v1152_v7  ;;  %v1623_v35 = vmul.f32 %v1965_v0, %v3659_v62  ;;  %v1547_v23 = vrot.slane %v1539_v5, 2 }
 0x1e2   : > { %v1277_v27 = vadd.f32 %v1269_v20, %v1253_v60  ;;  %v1404_v48 = vadd.f32 %v1400_v16, %v1392_v58  ;;  %v1531_v24 = vadd.f32 %v1523_v2, %v1507_v33  ;;  %v1113_v12 = vrot.slane %v3619_v50, 1 }
 0x1e3   : > { %v1305_v54 = vrot.slane %v1297_v52, 2  ;;  %v1432_v38 = vrot.slane %v1424_v28, 1  ;;  %v1137_v9 = vmul.f32 %v3619_v50, %v3619_v50  ;;  %v1125_v4 = vrot.slane %v3619_v50, 2 }
 0x1e4   : > { %v1289_v25 = vadd.f32 %v1285_v36, %v1277_v27  ;;  %v1416_v10 = vadd.f32 %v1412_v6, %v1404_v48  ;;  %v1555_v31 = vadd.f32 %v1547_v23, %v1531_v24  ;;  %v1121_v60 = vmul.f32 %v1113_v12, %v3619_v50 }
 0x1e5   : > { %v1145_v20 = vrot.slane %v1137_v9, 1  ;;  %v1157_v0 = vmul.f32 3.0, %v3619_v50  ;;  %v1178_v16 = vmul.f32 %v3527_v57, %v3619_v50  ;;  %v1190_v52 = vmul.f32 %v3536_v49, %v3619_v50 }
 0x1e6   : > { %v1313_v7 = vadd.f32 %v1305_v54, %v1289_v25  ;;  %v1440_v19 = vadd.f32 %v1432_v38, %v1416_v10  ;;  %v1567_v27 = vadd.f32 %v1563_v18, %v1555_v31  ;;  %v1214_v6 = vmul.f32 %v3540_v53, %v3619_v50 }
 0x1e7   : > { %v1468_v28 = vrot.slane %v1460_v21, 2  ;;  %v1595_v5 = vrot.slane %v1587_v17, 1  ;;  %v1161_v33 = vmul.f32 %v1157_v0, %v3619_v50  ;;  %v1182_v54 = vadd.f32 %v1178_v16, %v3553_v40 }
 0x1e8   : > { %1321 = vst [vmem:[#allocation1] sm:$0xff] %v1313_v7  ;;  %v1452_v25 = vadd.f32 %v1448_v22, %v1440_v19  ;;  %v1579_v36 = vadd.f32 %v1575_v29, %v1567_v27  ;;  %v1133_v58 = vmul.f32 %v1125_v4, %v3619_v50  ;;  %v1198_v2 = vrot.slane %v1190_v52, 1 }
 0x1e9   : > { %v1153_v38 = vsub.f32 %v1137_v9, %v1145_v20  ;;  %v1966_v18 = vadd.f32 -1.0, %v1161_v33  ;;  %v1222_v48 = vrot.slane %v1214_v6, 2  ;;  %v1262_v24 = vmul.f32 %v3574_v41, %v1121_v60 }
 0x1ea   : > { %v3698_v23 = vadd.f32 %v1468_v28, %v1452_v25  ;;  %v1603_v12 = vadd.f32 %v1595_v5, %v1579_v36  ;;  %v1206_v10 = vadd.f32 %v1198_v2, %v1182_v54  ;;  %v1341_v21 = vmul.f32 %v3544_v59, %v3619_v50 }
 0x1eb   : > { %v1631_v17 = vrot.slane %v1623_v35, 2  ;;  %v1238_v31 = vmul.f32 %v3566_v30, %v1121_v60  ;;  %v1353_v29 = vmul.f32 %v3561_v8, %v3619_v50  ;;  %v1377_v22 = vmul.f32 %v3578_v42, %v3619_v50 }
 0x1ec   : > { %v1615_v9 = vadd.f32 %v1611_v13, %v1603_v12  ;;  %v1230_v4 = vadd.f32 %v1222_v48, %v1206_v10  ;;  %v1250_v7 = vmul.f32 %v3570_v47, %v1133_v58  ;;  %v1345_v20 = vadd.f32 %v1341_v21, %v3557_v37 }
 0x1ed   : > { %v1270_v0 = vrot.slane %v1262_v24, 1  ;;  %v1286_v16 = vmul.f32 %v3587_v34, %v1153_v38  ;;  %v1298_v19 = vmul.f32 %v1966_v18, %v3596_v44  ;;  %v1361_v35 = vrot.slane %v1353_v29, 1 }
 0x1ee   : > { %v3711_v27 = vadd.f32 %v1631_v17, %v1615_v9  ;;  %v1242_v52 = vadd.f32 %v1238_v31, %v1230_v4  ;;  %v1385_v6 = vrot.slane %v1377_v22, 2  ;;  %v1401_v28 = vmul.f32 %v3607_v14, %v1121_v60  ;;  %v1045_v17 = vpop.f32.mrf.mxu2 }
 0x1ef   : > { %v1369_v5 = vadd.f32 %v1361_v35, %v1345_v20  ;;  %v1413_v13 = vmul.f32 %v3613_v46, %v1133_v58  ;;  %v1504_v33 = vmul.f32 %v3589_v61, %v3619_v50  ;;  %v1516_v54 = vmul.f32 %v3609_v15, %v3619_v50 }
 0x1f0   : > { %v1254_v25 = vadd.f32 %v1250_v7, %v1242_v52  ;;  %v1425_v36 = vmul.f32 %v3617_v51, %v1121_v60  ;;  %v1540_v2 = vmul.f32 %v3631_v56, %v3619_v50  ;;  %v1564_v48 = vmul.f32 %v3636_v39, %v1121_v60 }
 0x1f1   : > { %v1393_v24 = vadd.f32 %v1385_v6, %v1369_v5  ;;  %v1461_v12 = vmul.f32 %v1966_v18, %v3629_v55  ;;  %v1508_v10 = vadd.f32 %v1504_v33, %v3598_v11  ;;  %v1524_v21 = vrot.slane %v1516_v54, 1 }
 0x1f2   : > { %v1278_v31 = vadd.f32 %v1270_v0, %v1254_v25  ;;  %v1548_v29 = vrot.slane %v1540_v2, 2  ;;  %v1576_v22 = vmul.f32 %v3638_v32, %v1133_v58  ;;  %v1588_v9 = vmul.f32 %v3651_v26, %v1121_v60 }
 0x1f3   : > { %v1405_v4 = vadd.f32 %v1401_v28, %v1393_v24  ;;  %v1532_v7 = vadd.f32 %v1524_v21, %v1508_v10  ;;  %v1612_v50 = vmul.f32 %v3653_v45, %v1153_v38  ;;  %v1624_v20 = vmul.f32 %v1966_v18, %v3659_v62 }
 0x1f4   : > { %v1290_v35 = vadd.f32 %v1286_v16, %v1278_v31  ;;  %v1306_v52 = vrot.slane %v1298_v19, 2  ;;  %v3730_v6 = vadd.f32 %v1045_v17, %v3663_v3  ;;  %v1433_v33 = vrot.slane %v1425_v36, 1 }
 0x1f5   : > { %v1417_v5 = vadd.f32 %v1413_v13, %v1405_v4  ;;  %v1556_v0 = vadd.f32 %v1548_v29, %v1532_v7  ;;  %v1449_v25 = vmul.f32 %v3625_v63, %v1153_v38  ;;  %v1469_v58 = vrot.slane %v1461_v12, 2 }
 0x1f6   : > { %v1314_v54 = vadd.f32 %v1306_v52, %v1290_v35  ;;  %1085 = vst [vmem:[%s2634_s9 + $0x30] sm:$0xf] %v3730_v6  ;;  %v1114_v60 = vrot.slane %v3730_v6, 1  ;;  %v1158_v18 = vmul.f32 3.0, %v3730_v6  ;;  %v1179_v16 = vmul.f32 %v3527_v57, %v3730_v6 }
 0x1f7   : > { %v1441_v28 = vadd.f32 %v1433_v33, %v1417_v5  ;;  %v1568_v2 = vadd.f32 %v1564_v48, %v1556_v0  ;;  %v1596_v3 = vrot.slane %v1588_v9, 1  ;;  %v1126_v19 = vrot.slane %v3730_v6, 2 }
 0x1f8   : > { %1322 = vst [vmem:[#allocation1 + $0x9] sm:$0xff] %v1314_v54  ;;  %v1138_v13 = vmul.f32 %v3730_v6, %v3730_v6  ;;  %v1191_v38 = vmul.f32 %v3536_v49, %v3730_v6  ;;  %v1162_v12 = vmul.f32 %v1158_v18, %v3730_v6  ;;  %v1183_v48 = vadd.f32 %v1179_v16, %v3553_v40 }
 0x1f9   : > { %v1453_v36 = vadd.f32 %v1449_v25, %v1441_v28  ;;  %v1580_v24 = vadd.f32 %v1576_v22, %v1568_v2  ;;  %v3747_v10 = vmul.f32 %v1114_v60, %v3730_v6  ;;  %v1215_v17 = vmul.f32 %v3540_v53, %v3730_v6 }
 0x1fa   : > { %v1199_v21 = vrot.slane %v1191_v38, 1  ;;  %v3754_v9 = vmul.f32 %v1126_v19, %v3730_v6  ;;  %v1146_v4 = vrot.slane %v1138_v13, 1  ;;  %v1632_v52 = vrot.slane %v1624_v20, 2 }
 0x1fb   : > { %v3751_v31 = vadd.f32 %v1469_v58, %v1453_v36  ;;  %v1604_v29 = vadd.f32 %v1596_v3, %v1580_v24  ;;  %v1223_v22 = vrot.slane %v1215_v17, 2  ;;  %v3756_v5 = vadd.f32 -1.0, %v1162_v12  ;;  %v4120_v12 = vld [vmem:[#allocation32_spill] sm:$0xff]  ;;  %v4122_v17 = vld [vmem:[#allocation25_spill] sm:$0xff] }
 0x1fc   : > { %v1207_v7 = vadd.f32 %v1199_v21, %v1183_v48  ;;  %v1239_v0 = vmul.f32 %v3566_v30, %v3747_v10  ;;  %v1263_v54 = vmul.f32 %v3574_v41, %v3747_v10  ;;  %v3764_v58 = vsub.f32 %v1138_v13, %v1146_v4  ;;  %v4121_v48 = vld [vmem:[#allocation33_spill] sm:$0xff]  ;;  %v1068_v21 = vpop.f32.mrf.mxu3 }
 0x1fd   : > { %v1616_v35 = vadd.f32 %v1612_v50, %v1604_v29  ;;  %v1251_v28 = vmul.f32 %v3570_v47, %v3754_v9  ;;  %v1299_v50 = vmul.f32 %v3756_v5, %v3596_v44  ;;  %v1342_v20 = vmul.f32 %v3544_v59, %v3730_v6  ;;  %v4123_v29 = vld [vmem:[#allocation31_spill] sm:$0xff] }
 0x1fe   : > { %v1231_v33 = vadd.f32 %v1223_v22, %v1207_v7  ;;  %v1271_v18 = vrot.slane %v1263_v54, 1  ;;  %v1354_v16 = vmul.f32 %v3561_v8, %v3730_v6  ;;  %v1287_v19 = vmul.f32 %v3587_v34, %v3764_v58 }
 0x1ff   : > { %v3762_v25 = vadd.f32 %v1632_v52, %v1616_v35  ;;  %v1307_v13 = vrot.slane %v1299_v50, 2  ;;  %v1346_v38 = vadd.f32 %v1342_v20, %v3557_v37  ;;  %vm655_vm8 = vcmp.ge.f32.partialorder %v4120_v12, 0.0 }
 0x200   : > { %v1243_v60 = vadd.f32 %v1239_v0, %v1231_v33  ;;  %v1362_v24 = vrot.slane %v1354_v16, 1  ;;  %vm656_vm11 = vcmp.ge.f32.partialorder %v4121_v48, 0.0  ;;  %v952_v4 = vadd.f32 %v4123_v29, %v4122_v17 }
 0x201   : > { %v1378_v7 = vmul.f32 %v3578_v42, %v3730_v6  ;;  %v4124_v35 = vmov 0.0   ;;  %v3794_v16 = vmul.f32 %v3609_v15, %v3730_v6 }
 0x202   : > { %v1255_v2 = vadd.f32 %v1251_v28, %v1243_v60  ;;  %v1916_v52 = vsel %vm653_vm6, 1.0, %v4124_v35  ;;  %v1917_v43 = vsel %vm654_vm9, 1.0, %v4124_v35  ;;  %v1918_v1 = vsel %vm655_vm8, 1.0, %v4124_v35 }
 0x203   : > { %v1919_v33 = vsel %vm656_vm11, 1.0, %v4124_v35  ;;  %v1078_v0 = vadd.f32 %v1068_v21, %v952_v4  ;;  %v1091_v54 = vrot.slane %v1917_v43, 7  ;;  %v1370_v60 = vadd.f32 %v1362_v24, %v1346_v38 }
 0x204   : > { %v1279_v3 = vadd.f32 %v1271_v18, %v1255_v2  ;;  %v1092_v28 = vrot.slane %v1918_v1, 6  ;;  %v1093_v50 = vrot.slane %v1919_v33, 5  ;;  %v1386_v20 = vrot.slane %v1378_v7, 2 }
 0x205   : > { %1086 = vst [vmem:[%s2634_s9 + $0x38] sm:$0xf] %v1078_v0  ;;  %v1095_v2 = vsel %vm1094_vm10, %v1916_v52, %v1091_v54  ;;  %v1505_v18 = vmul.f32 %v3589_v61, %v3730_v6  ;;  %v4125_v38 = vlaneseq  ;;  %v1127_v24 = vrot.slane %v1078_v0, 2 }
 0x206   : > { %v1291_v36 = vadd.f32 %v1287_v19, %v1279_v3  ;;  %v1097_v3 = vsel %vm1096_vm12, %v1092_v28, %v1093_v50  ;;  %v1115_v19 = vrot.slane %v1078_v0, 1  ;;  %v1139_v12 = vmul.f32 %v1078_v0, %v1078_v0 }
 0x207   : > { %vm3797_vm14 = vcmp.lt.s32.totalorder %v4125_v38, 512  ;;  %v1394_v48 = vadd.f32 %v1386_v20, %v1370_v60  ;;  %v1159_v17 = vmul.f32 3.0, %v1078_v0  ;;  %v1180_v29 = vmul.f32 %v3527_v57, %v1078_v0 }
 0x208   : > { %v1315_v22 = vadd.f32 %v1307_v13, %v1291_v36  ;;  %v1099_v13 = vsel %vm1098_vm13, %v1095_v2, %v1097_v3  ;;  %v1123_v21 = vmul.f32 %v1115_v19, %v1078_v0  ;;  %v1147_v4 = vrot.slane %v1139_v12, 1  ;;  %v1709_v36 = vld [vmem:[%s2634_s9 + $0x8] sm:$0xff] (%p2579_p5) }
 0x209   : > { %1964 = vst.msk [vmem:[%s2634_s9 + $0x24] ss:$8 sm:$0xf] %vm3797_vm14, %v1099_v13  ;;  %v1192_v7 = vmul.f32 %v3536_v49, %v1078_v0  ;;  %v1402_v52 = vmul.f32 %v3607_v14, %v3747_v10  ;;  %v1135_v43 = vmul.f32 %v1127_v24, %v1078_v0  ;;  %v1163_v1 = vmul.f32 %v1159_v17, %v1078_v0 }
 0x20a   : > { %1323 = vst [vmem:[#allocation1 + $0x12] sm:$0xff] %v1315_v22  ;;  %v1216_v22 = vmul.f32 %v3540_v53, %v1078_v0  ;;  %v1184_v33 = vadd.f32 %v1180_v29, %v3553_v40  ;;  %v1509_v54 = vadd.f32 %v1505_v18, %v3598_v11  ;;  %v1525_v60 = vrot.slane %v3794_v16, 1 }
 0x20b   : > { %v1155_v28 = vsub.f32 %v1139_v12, %v1147_v4  ;;  %v1200_v50 = vrot.slane %v1192_v7, 1  ;;  %v1406_v20 = vadd.f32 %v1402_v52, %v1394_v48  ;;  %v1968_v57 = vadd.f32 -1.0, %v1163_v1  ;;  %1710 = vst [vmem:[%s1694_s10 + $0x8] sm:$0xff] (%p2579_p5), %v1709_v36 }
 0x20c   : > { %v1240_v2 = vmul.f32 %v3566_v30, %v1123_v21  ;;  %v1343_v49 = vmul.f32 %v3544_v59, %v1078_v0  ;;  %v1224_v3 = vrot.slane %v1216_v22, 2  ;;  %v1355_v19 = vmul.f32 %v3561_v8, %v1078_v0 }
 0x20d   : > { %v1208_v53 = vadd.f32 %v1200_v50, %v1184_v33  ;;  %v1379_v13 = vmul.f32 %v3578_v42, %v1078_v0  ;;  %v1252_v40 = vmul.f32 %v3570_v47, %v1135_v43  ;;  %v1264_v18 = vmul.f32 %v3574_v41, %v1123_v21 }
 0x20e   : > { %v1347_v16 = vadd.f32 %v1343_v49, %v3557_v37  ;;  %v1403_v38 = vmul.f32 %v3607_v14, %v1123_v21  ;;  %v1288_v12 = vmul.f32 %v3587_v34, %v1155_v28  ;;  %v1363_v30 = vrot.slane %v1355_v19, 1 }
 0x20f   : > { %v1232_v24 = vadd.f32 %v1224_v3, %v1208_v53  ;;  %v1415_v59 = vmul.f32 %v3613_v46, %v1135_v43  ;;  %v1387_v48 = vrot.slane %v1379_v13, 2  ;;  %v1427_v17 = vmul.f32 %v3617_v51, %v1123_v21 }
 0x210   : > { %v1451_v8 = vmul.f32 %v3625_v63, %v1155_v28  ;;  %v1463_v42 = vmul.f32 %v1968_v57, %v3629_v55  ;;  %v1371_v29 = vadd.f32 %v1363_v30, %v1347_v16  ;;  %v1506_v41 = vmul.f32 %v3589_v61, %v1078_v0 }
 0x211   : > { %v1244_v47 = vadd.f32 %v1240_v2, %v1232_v24  ;;  %v1518_v37 = vmul.f32 %v3609_v15, %v1078_v0  ;;  %v1272_v14 = vrot.slane %v1264_v18, 1  ;;  %v1300_v4 = vmul.f32 %v1968_v57, %v3596_v44 }
 0x212   : > { %v1542_v34 = vmul.f32 %v3631_v56, %v1078_v0  ;;  %v1566_v7 = vmul.f32 %v3636_v39, %v1123_v21  ;;  %v1395_v52 = vadd.f32 %v1387_v48, %v1371_v29  ;;  %v1510_v1 = vadd.f32 %v1506_v41, %v3598_v11 }
 0x213   : > { %v1256_v22 = vadd.f32 %v1252_v40, %v1244_v47  ;;  %v1526_v33 = vrot.slane %v1518_v37, 1  ;;  %v1578_v2 = vmul.f32 %v3638_v32, %v1135_v43  ;;  %v1590_v49 = vmul.f32 %v3651_v26, %v1123_v21 }
 0x214   : > { %v1550_v50 = vrot.slane %v1542_v34, 2  ;;  %v1614_v61 = vmul.f32 %v3653_v45, %v1155_v28  ;;  %v1407_v53 = vadd.f32 %v1403_v38, %v1395_v52  ;;  %v1626_v44 = vmul.f32 %v1968_v57, %v3659_v62 }
 0x215   : > { %v1280_v15 = vadd.f32 %v1272_v14, %v1256_v22  ;;  %v1534_v3 = vadd.f32 %v1526_v33, %v1510_v1  ;;  %v1414_v0 = vmul.f32 %v3613_v46, %v3754_v9  ;;  %v1426_v19 = vmul.f32 %v3617_v51, %v3747_v10  ;;  %v4131_v1 = vld [vmem:[#allocation29_spill] sm:$0xff] }
 0x216   : > { %v1541_v11 = vmul.f32 %v3631_v56, %v3730_v6  ;;  %v1308_v13 = vrot.slane %v1300_v4, 2  ;;  %v1419_v40 = vadd.f32 %v1415_v59, %v1407_v53  ;;  %v1435_v21 = vrot.slane %v1427_v17, 1 }
 0x217   : > { %v1292_v43 = vadd.f32 %v1288_v12, %v1280_v15  ;;  %v1558_v18 = vadd.f32 %v1550_v50, %v1534_v3  ;;  %v1418_v28 = vadd.f32 %v1414_v0, %v1406_v20  ;;  %v1533_v16 = vadd.f32 %v1525_v60, %v1509_v54 }
 0x218   : > { %v1443_v24 = vadd.f32 %v1435_v21, %v1419_v40  ;;  %v1434_v57 = vrot.slane %v1426_v19, 1  ;;  %v1549_v48 = vrot.slane %v1541_v11, 2  ;;  %v1471_v47 = vrot.slane %v1463_v42, 2 }
 0x219   : > { %v1316_v38 = vadd.f32 %v1308_v13, %v1292_v43  ;;  %v1570_v30 = vadd.f32 %v1566_v7, %v1558_v18  ;;  %v1598_v51 = vrot.slane %v1590_v49, 1  ;;  %v1450_v59 = vmul.f32 %v3625_v63, %v3764_v58  ;;  %v1713_v49 = vld [vmem:[%s2634_s9 + $0x18] sm:$0xff] (%p2579_p5) }
 0x21a   : > { %v1455_v46 = vadd.f32 %v1451_v8, %v1443_v24  ;;  %v1442_v41 = vadd.f32 %v1434_v57, %v1418_v28  ;;  %v1557_v56 = vadd.f32 %v1549_v48, %v1533_v16  ;;  %v1462_v54 = vmul.f32 %v3756_v5, %v3629_v55  ;;  %1714 = vst [vmem:[%s1694_s10 + $0x18] sm:$0xff] (%p2579_p5), %v1713_v49 }
 0x21b   : > { %1324 = vst [vmem:[#allocation1 + $0x1b] sm:$0xff] %v1316_v38  ;;  %v1582_v29 = vadd.f32 %v1578_v2, %v1570_v30  ;;  %v1565_v60 = vmul.f32 %v3636_v39, %v3747_v10  ;;  %v1634_v17 = vrot.slane %v1626_v44, 2  ;;  %v1577_v4 = vmul.f32 %v3638_v32, %v3754_v9  ;;  %v1711_v2 = vld [vmem:[%s2634_s9 + $0x10] sm:$0xff] (%p2579_p5) }
 0x21c   : > { %v1479_v6 = vadd.f32 %v1471_v47, %v1455_v46  ;;  %v1454_v8 = vadd.f32 %v1450_v59, %v1442_v41  ;;  %v1470_v14 = vrot.slane %v1462_v54, 2  ;;  %v1589_v34 = vmul.f32 %v3651_v26, %v3747_v10  ;;  %1712 = vst [vmem:[%s1694_s10 + $0x10] sm:$0xff] (%p2579_p5), %v1711_v2 }
 0x21d   : > { %v1606_v12 = vadd.f32 %v1598_v51, %v1582_v29  ;;  %v1569_v42 = vadd.f32 %v1565_v60, %v1557_v56  ;;  %v1613_v32 = vmul.f32 %v3653_v45, %v3764_v58  ;;  %v1625_v26 = vmul.f32 %v3756_v5, %v3659_v62  ;;  %v4129_v45 = vld [vmem:[#allocation30_spill] sm:$0xff]  ;;  %v4130_v62 = vld [vmem:[#allocation27_spill] sm:$0xff] }
 0x21e   : > { %v1478_v55 = vadd.f32 %v1470_v14, %v1454_v8  ;;  %v1597_v39 = vrot.slane %v1589_v34, 1  ;;  %vm1658_vm15 = vcmp.lt.f32.partialorder %v4129_v45, -0.05  ;;  %vm1659_vm1 = vcmp.lt.f32.partialorder %v4130_v62, -0.05 }
 0x21f   : > { %v1618_v20 = vadd.f32 %v1614_v61, %v1606_v12  ;;  %v1581_v7 = vadd.f32 %v1577_v4, %v1569_v42  ;;  %v1633_v9 = vrot.slane %v1625_v26, 2  ;;  %vm1660_vm2 = vcmp.lt.f32.partialorder %v4131_v1, -0.05 }
 0x220   : > { %v1976_v33 = vsel %vm1660_vm2, 1.0, %v4124_v35 }
 0x221   : > { %v1642_v37 = vadd.f32 %v1634_v17, %v1618_v20  ;;  %v1605_v22 = vadd.f32 %v1597_v39, %v1581_v7 }
 0x222   : > { %v1326_v63 = vld [vmem:[#allocation1 + $0x1] ss:$9 sm:$0xff] }
 0x223   : > { %1970 = vst.msk [vmem:[%s2634_s9 + $0x25] ss:$8 sm:$0xf] %vm3797_vm14, %v1326_v63  ;;  %v1617_v10 = vadd.f32 %v1613_v32, %v1605_v22 }
 0x224   : > { %1484 = vst [vmem:[#allocation1] sm:$0xff] %v3698_v23 }
 0x225   : > { %1485 = vst [vmem:[#allocation1 + $0x9] sm:$0xff] %v3751_v31  ;;  %v1641_v23 = vadd.f32 %v1633_v9, %v1617_v10  ;;  %v4128_v31 = vld [vmem:[#allocation26_spill] sm:$0xff] }
 0x226   : > { %1486 = vst [vmem:[#allocation1 + $0x12] sm:$0xff] %v1478_v55  ;;  %vm1657_vm0 = vcmp.lt.f32.partialorder %v4128_v31, -0.05 }
 0x227   : > { %1487 = vst [vmem:[#allocation1 + $0x1b] sm:$0xff] %v1479_v6  ;;  %v1973_v58 = vsel %vm1657_vm0, 1.0, %v4124_v35 }
 0x22e   : > { %v1489_v52 = vld [vmem:[#allocation1 + $0x1] ss:$9 sm:$0xff] }
 0x22f   : > { %1971 = vst.msk [vmem:[%s2634_s9 + $0x26] ss:$8 sm:$0xf] %vm3797_vm14, %v1489_v52 }
 0x230   : > { %1647 = vst [vmem:[#allocation1] sm:$0xff] %v3711_v27  ;;  %v1974_v27 = vsel %vm1658_vm15, 1.0, %v4124_v35 }
 0x231   : > { %1648 = vst [vmem:[#allocation1 + $0x9] sm:$0xff] %v3762_v25  ;;  %v1975_v25 = vsel %vm1659_vm1, 1.0, %v4124_v35  ;;  %v1707_v35 = vld [vmem:[%s2634_s9] sm:$0xff] (%p2579_p5) }
 0x232   : > { %1649 = vst [vmem:[#allocation1 + $0x12] sm:$0xff] %v1641_v23 }
 0x233   : > { %1650 = vst [vmem:[#allocation1 + $0x1b] sm:$0xff] %v1642_v37 }
 0x234   : > { %1708 = vst [vmem:[%s1694_s10] sm:$0xff] (%p2579_p5), %v1707_v35 }
 0x23a   : > { %v1652_v5 = vld [vmem:[#allocation1 + $0x1] ss:$9 sm:$0xff] }
 0x23b   : > { %1972 = vst.msk [vmem:[%s2634_s9 + $0x27] ss:$8 sm:$0xf] %vm3797_vm14, %v1652_v5 }
 0x23c   : > { %1673 = vst [vmem:[#allocation1] sm:$0xff] %v1973_v58 }
 0x23d   : > { %1674 = vst [vmem:[#allocation1 + $0x9] sm:$0xff] %v1974_v27 }
 0x23e   : > { %1675 = vst [vmem:[#allocation1 + $0x12] sm:$0xff] %v1975_v25 }
 0x23f   : > { %1676 = vst [vmem:[#allocation1 + $0x1b] sm:$0xff] %v1976_v33 }
 0x242   : > { %v1715_v61 = vld [vmem:[%s2634_s9 + $0x20] sm:$0xff] (%p2579_p5)  ;;  %v1717_v15 = vld [vmem:[%s2634_s9 + $0x28] sm:$0xff] (%p2579_p5)  ;;  %v1719_v53 = vld [vmem:[%s2634_s9 + $0x30] sm:$0xff] (%p2579_p5) }
 0x243   : > { %1689 = sbr.rel (!%p2579_p5) target bundleno = 595 (0x253), region = 51  ;;  %1716 = vst [vmem:[%s1694_s10 + $0x40] sm:$0xff] (%p2579_p5), %v1715_v61  ;;  %v1721_v3 = vld [vmem:[%s2634_s9 + $0x38] sm:$0xff] (%p2579_p5) }
 0x244   : > { %1718 = vst [vmem:[%s1694_s10 + $0x48] sm:$0xff] (%p2579_p5), %v1717_v15 }
 0x245   : > { %1720 = vst [vmem:[%s1694_s10 + $0x50] sm:$0xff] (%p2579_p5), %v1719_v53 }
 0x246   : > { %v1678_v50 = vld [vmem:[#allocation1 + $0x5] ss:$9 sm:$0xff]  ;;  %1722 = vst [vmem:[%s1694_s10 + $0x58] sm:$0xff] (%p2579_p5), %v1721_v3 }
 0x247   : > { %1977 = vst.msk [vmem:[%s2634_s9 + $0x40] ss:$8 sm:$0xf] %vm3797_vm14, %v1678_v50 }
 0x24e   : > { %v1723_v44 = vld [vmem:[%s2634_s9 + $0x40] sm:$0xff]  ;;  %v1725_v0 = vld [vmem:[%s2634_s9 + $0x48] sm:$0xff]  ;;  %v1727_v19 = vld [vmem:[%s2634_s9 + $0x50] sm:$0xff] }
 0x24f   : > { %1724 = vst [vmem:[%s1694_s10 + $0x80] sm:$0xff] %v1723_v44  ;;  %v1729_v11 = vld [vmem:[%s2634_s9 + $0x58] sm:$0xff] }
 0x250   : > { %1726 = vst [vmem:[%s1694_s10 + $0x88] sm:$0xff] %v1725_v0 }
 0x251   : > { %1728 = vst [vmem:[%s1694_s10 + $0x90] sm:$0xff] %v1727_v19 }
 0x252   : > { %1730 = vst [vmem:[%s1694_s10 + $0x98] sm:$0xff] %v1729_v11 }
 0x253 PF: > { %s4136_s0 = sld [smem:[#allocation10_spill]] }
 0x254   : > { %s4137_s15 = sld [smem:[#allocation6_spill]] }
 0x255   : > { %s4138_s16 = sld [smem:[#allocation14_spill]] }
 0x256   : > { %s4139_s17 = sld [smem:[#allocation8_spill]] }
 0x257   : > { %s4140_s18 = sld [smem:[#allocation9_spill]] }
 0x258   : > { %s4141_s19 = sld [smem:[#allocation11_spill]] }
 0x259   : > { %s15_s21 = sadd.s32 1, %s4136_s0   ;;  %s4142_s20 = sld [smem:[#allocation13_spill]] }
 0x25a   : > { %p12_p1 = scmp.ge.s32.totalorder %s15_s21, 6  }
 0x25c   :  { %14 = sbr.rel (!%p12_p1) target bundleno = 10 (0xa), region = 131 }
 0x261   :  { %1746 = vsyncpa [#allocation3], 1 }
 0x262   :  { %1748 = vsyncpa [#allocation3 + $0x1], 1 }

</bundles_post_ra>
